<compile_context>
chip_gen: v6e
topology: v6e:2x2x1
jax: 0.10.0
libtpu: 0.0.40
codegen_flags: <defaults>
</compile_context>

<pallas_src>
import functools

import jax
import jax.numpy as jnp
from jax.experimental import pallas as pl
from jax.experimental.pallas import tpu as pltpu

LRELU_SLOPE = 0.2
KH = KW = 4
BN_EPS = 1e-5
VMEM_LIMIT = 48 * 1024 * 1024  # fits v5e/v6e/v7x physical VMEM


# ----------------------------- helpers ------------------------------------ #
def _round_up(x, m):
    return (x + m - 1) // m * m


def _k_pad(kdim):
    """Padded K: single block up to 2048, else a multiple of the 512 K-tile."""
    if kdim <= 2048:
        return _round_up(kdim, 128)
    return _round_up(kdim, 512)


def _k_tile(kp):
    if kp <= 2048:
        return kp, 1
    return 512, kp // 512


# ----------------------------- Pallas kernel ------------------------------ #
def _conv_mm_kernel(p_ref, w_ref, scale_ref, shift_ref, o_ref,
                    *, apply_lrelu, nk):
    """Fused im2col-matmul + per-output-channel affine + optional LeakyReLU.

    Grid = (M tiles [parallel], K tiles [arbitrary, last]).  bf16 inputs,
    f32 accumulation directly in the resident output block (no extra scratch).
    """
    def finalize(acc):
        y = acc * scale_ref[...] + shift_ref[...]
        if apply_lrelu:
            y = jnp.where(y >= 0, y, LRELU_SLOPE * y)
        return y.astype(o_ref.dtype)

    if nk == 1:
        # Whole K in one block: no accumulator, no pl.when overhead.
        acc = jnp.dot(p_ref[...], w_ref[...],
                      preferred_element_type=jnp.float32)
        o_ref[...] = finalize(acc)
    else:
        k = pl.program_id(1)

        @pl.when(k == 0)
        def _():
            o_ref[...] = jnp.zeros_like(o_ref)

        o_ref[...] += jnp.dot(p_ref[...], w_ref[...],
                              preferred_element_type=jnp.float32)

        @pl.when(k == nk - 1)
        def _():
            o_ref[...] = finalize(o_ref[...])


def conv_block(x_nhwc, w_pad, s_pad, b_pad, *, cout, stride, apply_lrelu,
               tile_m=256):
    """4x4 conv, reflect padding 1, given stride, fused affine + LeakyReLU.

    `w_pad`   : (Kp, Np)  bf16, pre-padded flattened HWIO weights.
    `s_pad`   : (1, Np)   f32 per-channel scale (padded).
    `b_pad`   : (1, Np)   f32 per-channel shift (padded).
    """
    n, h, w, cin = x_nhwc.shape
    kp, npad = w_pad.shape
    kdim = KH * KW * cin
    assert kdim <= kp
    tk, nk = _k_tile(kp)

    # reflect pad (glue, fused under jit)
    xp = jnp.pad(x_nhwc, ((0, 0), (1, 1), (1, 1), (0, 0)), mode='reflect')
    ho = (h + 2 - KH) // stride + 1
    wo = (w + 2 - KW) // stride + 1

    # im2col (glue): taps ordered (kh, kw, cin) to match HWIO weight flatten.
    # TODO(synk): replace with on-chip patch construction to avoid the 16x
    #             HBM expansion for large images.
    taps = []
    for kh in range(KH):
        for kw in range(KW):
            taps.append(xp[:, kh:kh + stride * (ho - 1) + 1:stride,
                           kw:kw + stride * (wo - 1) + 1:stride, :])
    patches = jnp.stack(taps, axis=3).reshape(
        n * ho * wo, kdim).astype(jnp.bfloat16)

    m = n * ho * wo
    tm = min(tile_m, _round_up(m, 16))
    mp = _round_up(m, tm)
    p_pad = jnp.pad(patches, ((0, mp - m), (0, kp - kdim)))

    kernel = functools.partial(_conv_mm_kernel,
                               apply_lrelu=apply_lrelu, nk=nk)
    out = pl.pallas_call(
        kernel,
        out_shape=jax.ShapeDtypeStruct((mp, npad), jnp.float32),
        grid_spec=pltpu.PrefetchScalarGridSpec(
            num_scalar_prefetch=0,
            grid=(mp // tm, nk),
            in_specs=[
                pl.BlockSpec((tm, tk), lambda i, k: (i, k)),    # patches
                pl.BlockSpec((tk, npad), lambda i, k: (k, 0)),  # weights
                pl.BlockSpec((1, npad), lambda i, k: (0, 0)),   # scale
                pl.BlockSpec((1, npad), lambda i, k: (0, 0)),   # shift
            ],
            out_specs=pl.BlockSpec((tm, npad), lambda i, k: (i, 0)),
        ),
        compiler_params=pltpu.CompilerParams(
            dimension_semantics=("parallel", "arbitrary"),
            vmem_limit_bytes=VMEM_LIMIT),
    )(p_pad, w_pad, s_pad, b_pad)

    return out[:m, :cout].reshape(n, ho, wo, cout)


# ----------------------------- parameters --------------------------------- #
def _layer_specs(in_channels, features):
    f = features
    return [
        # (name, cin, cout, stride, leaky_relu)
        ('initial', 2 * in_channels, f, 2, True),
        ('conv1', f, 2 * f, 2, True),
        ('conv2', 2 * f, 4 * f, 2, True),
        ('conv3', 4 * f, 8 * f, 1, True),
        ('final', 8 * f, 1, 1, False),
    ]


def _conv_w(key, cin, cout):
    fan_in = KH * KW * cin
    return jax.random.normal(key, (KH, KW, cin, cout),
                             jnp.float32) / jnp.sqrt(fan_in)


def _bn_params(key, c):
    k1, k2, k3, k4 = jax.random.split(key, 4)
    gamma = 1.0 + 0.1 * jax.random.normal(k1, (c,), jnp.float32)
    beta = 0.1 * jax.random.normal(k2, (c,), jnp.float32)
    mean = 0.1 * jax.random.normal(k3, (c,), jnp.float32)
    var = 0.5 + jax.random.uniform(k4, (c,), jnp.float32)
    scale = gamma / jnp.sqrt(var + BN_EPS)
    shift = beta - mean * scale
    return scale, shift


def init_params(key, in_channels=3, features=16):
    specs = _layer_specs(in_channels, features)
    keys = jax.random.split(key, 2 * len(specs))
    params = {}
    for i, (name, cin, cout, _stride, _lrelu) in enumerate(specs):
        params[f'{name}_w'] = _conv_w(keys[2 * i], cin, cout)
        if name in ('initial', 'final'):
            # Conv2d(bias=True), no BN: scale = 1, shift = bias.
            params[f'{name}_scale'] = jnp.ones((cout,), jnp.float32)
            params[f'{name}_shift'] = 0.1 * jax.random.normal(
                keys[2 * i + 1], (cout,), jnp.float32)
        else:
            s, b = _bn_params(keys[2 * i + 1], cout)
            params[f'{name}_scale'] = s
            params[f'{name}_shift'] = b
    return params


# ----------------------------- forward builder ----------------------------- #
def build_forward(params, in_channels=3, features=16):
    """Pre-pads/reshapes/casts the weights once and returns a jitted forward."""
    specs = _layer_specs(in_channels, features)
    prepared = []
    for name, cin, cout, stride, lrelu in specs:
        kdim = KH * KW * cin
        kp = _k_pad(kdim)
        npad = _round_up(cout, 128)
        wmat = params[f'{name}_w'].reshape(kdim, cout).astype(jnp.bfloat16)
        w_pad = jnp.pad(wmat, ((0, kp - kdim), (0, npad - cout)))
        s_pad = jnp.pad(params[f'{name}_scale'].astype(jnp.float32).reshape(1, cout),
                        ((0, 0), (0, npad - cout)))
        b_pad = jnp.pad(params[f'{name}_shift'].astype(jnp.float32).reshape(1, cout),
                        ((0, 0), (0, npad - cout)))
        prepared.append((w_pad, s_pad, b_pad, cout, stride, lrelu))

    def forward(x_nchw, y_nchw):
        # concat along channels (dim=1 in NCHW), go NHWC internally
        x = jnp.concatenate([x_nchw, y_nchw], axis=1)
        h = jnp.transpose(x, (0, 2, 3, 1)).astype(jnp.float32)
        for w_pad, s_pad, b_pad, cout, stride, lrelu in prepared:
            h = conv_block(h, w_pad, s_pad, b_pad, cout=cout, stride=stride,
                           apply_lrelu=lrelu)
        return jnp.transpose(h, (0, 3, 1, 2))  # -> NCHW

    return jax.jit(forward)


# ----------------------------- pure-JAX reference -------------------------- #
def _ref_conv(x, w, scale, shift, stride, apply_lrelu):
    xp = jnp.pad(x, ((0, 0), (1, 1), (1, 1), (0, 0)), mode='reflect')
    y = jax.lax.conv_general_dilated(
        xp, w, (stride, stride), 'VALID',
        dimension_numbers=('NHWC', 'HWIO', 'NHWC'))
    y = y * scale + shift
    if apply_lrelu:
        y = jnp.where(y >= 0, y, LRELU_SLOPE * y)
    return y


def reference_forward(params, x_nchw, y_nchw, in_channels=3, features=16):
    specs = _layer_specs(in_channels, features)
    x = jnp.concatenate([x_nchw, y_nchw], axis=1)
    h = jnp.transpose(x, (0, 2, 3, 1)).astype(jnp.float32)
    for name, _cin, _cout, stride, lrelu in specs:
        h = _ref_conv(h, params[f'{name}_w'], params[f'{name}_scale'],
                      params[f'{name}_shift'], stride, lrelu)
    return jnp.transpose(h, (0, 3, 1, 2))


# --------------------------------- main ------------------------------------ #
if __name__ == "__main__":
    key = jax.random.PRNGKey(0)
    k_params, kx, ky = jax.random.split(key, 3)

    batch, in_channels, spatial, features = 2, 3, 32, 16
    params = init_params(k_params, in_channels=in_channels, features=features)

    x = jax.random.normal(kx, (batch, in_channels, spatial, spatial), jnp.float32)
    y = jax.random.normal(ky, (batch, in_channels, spatial, spatial), jnp.float32)

    fwd = build_forward(params, in_channels=in_channels, features=features)
    out = jax.block_until_ready(fwd(x, y))

    # sanity: shape matches the PyTorch module (N, 1, 2, 2) for 32x32 inputs
    assert out.shape == (batch, 1, 2, 2), out.shape

    ref = jax.block_until_ready(
        reference_forward(params, x, y, in_channels=in_channels,
                          features=features))
    max_err = float(jnp.max(jnp.abs(out - ref)))
    # bf16 MXU inputs with f32 accumulation vs. pure-f32 reference
    assert jnp.allclose(out, ref, rtol=3e-2, atol=3e-2), max_err

    print("KERNEL_OK")
</pallas_src>

<mosaic_0001>
module attributes {stable_mosaic.version = 11 : i64} {
  func.func @_conv_mm_kernel(%arg0: i32, %arg1: i32, %arg2: memref<256x128xbf16, #tpu.memory_space<vmem>>, %arg3: memref<128x128xbf16, #tpu.memory_space<vmem>>, %arg4: memref<1x128xf32, #tpu.memory_space<vmem>>, %arg5: memref<1x128xf32, #tpu.memory_space<vmem>>, %arg6: memref<256x128xf32, #tpu.memory_space<vmem>>) attributes {dimension_semantics = [#tpu.dimension_semantics<parallel>, #tpu.dimension_semantics<arbitrary>], iteration_bounds = array<i64: 2, 1>, scalar_prefetch = 0 : i64, scratch_operands = 0 : i64, tpu.core_type = #tpu.core_type<tc>, window_params = [{transform_indices = @transform_0, window_bounds = array<i64: 256, 128>}, {transform_indices = @transform_1, window_bounds = array<i64: 128, 128>}, {pipeline_mode = #tpu.pipeline_mode<synchronous>, transform_indices = @transform_2, window_bounds = array<i64: 1, 128>}, {pipeline_mode = #tpu.pipeline_mode<synchronous>, transform_indices = @transform_3, window_bounds = array<i64: 1, 128>}, {transform_indices = @transform_4, window_bounds = array<i64: 256, 128>}]} {
    %c0 = arith.constant 0 : index
    %c0_0 = arith.constant 0 : index
    %0 = vector.load %arg2[%c0, %c0_0] : memref<256x128xbf16, #tpu.memory_space<vmem>>, vector<256x128xbf16>
    %c0_1 = arith.constant 0 : index
    %c0_2 = arith.constant 0 : index
    %1 = vector.load %arg3[%c0_1, %c0_2] : memref<128x128xbf16, #tpu.memory_space<vmem>>, vector<128x128xbf16>
    %cst = arith.constant dense<0.000000e+00> : vector<256x128xf32>
    %2 = tpu.matmul %0, %1, %cst {dimension_numbers = #tpu.dot_dimension_numbers<[1], [0], [0], [1], [0, 0, 1, 1], [], []>} : vector<256x128xbf16>, vector<128x128xbf16>, vector<256x128xf32> -> vector<256x128xf32>
    %c0_3 = arith.constant 0 : index
    %c0_4 = arith.constant 0 : index
    %3 = vector.load %arg4[%c0_3, %c0_4] : memref<1x128xf32, #tpu.memory_space<vmem>>, vector<1x128xf32>
    %4 = vector.broadcast %3 : vector<1x128xf32> to vector<256x128xf32>
    %5 = arith.mulf %2, %4 : vector<256x128xf32>
    %c0_5 = arith.constant 0 : index
    %c0_6 = arith.constant 0 : index
    %6 = vector.load %arg5[%c0_5, %c0_6] : memref<1x128xf32, #tpu.memory_space<vmem>>, vector<1x128xf32>
    %7 = vector.broadcast %6 : vector<1x128xf32> to vector<256x128xf32>
    %8 = arith.addf %5, %7 : vector<256x128xf32>
    %cst_7 = arith.constant 0.000000e+00 : f32
    %9 = vector.broadcast %cst_7 : f32 to vector<256x128xf32>
    %10 = arith.cmpf oge, %8, %9 : vector<256x128xf32>
    %cst_8 = arith.constant 2.000000e-01 : f32
    %11 = vector.broadcast %cst_8 : f32 to vector<256x128xf32>
    %12 = arith.mulf %11, %8 : vector<256x128xf32>
    %13 = arith.select %10, %8, %12 : vector<256x128xi1>, vector<256x128xf32>
    %c0_9 = arith.constant 0 : index
    %c0_10 = arith.constant 0 : index
    %14 = vector.load %arg6[%c0_9, %c0_10] : memref<256x128xf32, #tpu.memory_space<vmem>>, vector<256x128xf32>
    tpu.vector_store %arg6[%c0_9, %c0_10], %13 {strides = array<i32>} : memref<256x128xf32, #tpu.memory_space<vmem>>, vector<256x128xf32>,
    return
  }
  func.func @transform_0(%arg0: i32, %arg1: i32) -> (i32, i32) {
    %c0_i32 = arith.constant 0 : i32
    return %arg0, %arg1 : i32, i32
  }
  func.func @transform_1(%arg0: i32, %arg1: i32) -> (i32, i32) {
    %c0_i32 = arith.constant 0 : i32
    %c0_i32_0 = arith.constant 0 : i32
    return %arg1, %c0_i32 : i32, i32
  }
  func.func @transform_2(%arg0: i32, %arg1: i32) -> (i32, i32) {
    %c0_i32 = arith.constant 0 : i32
    %c0_i32_0 = arith.constant 0 : i32
    %c0_i32_1 = arith.constant 0 : i32
    return %c0_i32, %c0_i32_0 : i32, i32
  }
  func.func @transform_3(%arg0: i32, %arg1: i32) -> (i32, i32) {
    %c0_i32 = arith.constant 0 : i32
    %c0_i32_0 = arith.constant 0 : i32
    %c0_i32_1 = arith.constant 0 : i32
    return %c0_i32, %c0_i32_0 : i32, i32
  }
  func.func @transform_4(%arg0: i32, %arg1: i32) -> (i32, i32) {
    %c0_i32 = arith.constant 0 : i32
    %c0_i32_0 = arith.constant 0 : i32
    return %arg0, %c0_i32 : i32, i32
  }
}

module attributes {stable_mosaic.version = 11 : i64} {
  func.func @_conv_mm_kernel(%arg0: i32, %arg1: i32, %arg2: memref<128x256xbf16, #tpu.memory_space<vmem>>, %arg3: memref<256x128xbf16, #tpu.memory_space<vmem>>, %arg4: memref<1x128xf32, #tpu.memory_space<vmem>>, %arg5: memref<1x128xf32, #tpu.memory_space<vmem>>, %arg6: memref<128x128xf32, #tpu.memory_space<vmem>>) attributes {dimension_semantics = [#tpu.dimension_semantics<parallel>, #tpu.dimension_semantics<arbitrary>], iteration_bounds = array<i64: 1, 1>, scalar_prefetch = 0 : i64, scratch_operands = 0 : i64, tpu.core_type = #tpu.core_type<tc>, window_params = [{transform_indices = @transform_0, window_bounds = array<i64: 128, 256>}, {transform_indices = @transform_1, window_bounds = array<i64: 256, 128>}, {pipeline_mode = #tpu.pipeline_mode<synchronous>, transform_indices = @transform_2, window_bounds = array<i64: 1, 128>}, {pipeline_mode = #tpu.pipeline_mode<synchronous>, transform_indices = @transform_3, window_bounds = array<i64: 1, 128>}, {transform_indices = @transform_4, window_bounds = array<i64: 128, 128>}]} {
    %c0 = arith.constant 0 : index
    %c0_0 = arith.constant 0 : index
    %0 = vector.load %arg2[%c0, %c0_0] : memref<128x256xbf16, #tpu.memory_space<vmem>>, vector<128x256xbf16>
    %c0_1 = arith.constant 0 : index
    %c0_2 = arith.constant 0 : index
    %1 = vector.load %arg3[%c0_1, %c0_2] : memref<256x128xbf16, #tpu.memory_space<vmem>>, vector<256x128xbf16>
    %cst = arith.constant dense<0.000000e+00> : vector<128x128xf32>
    %2 = tpu.matmul %0, %1, %cst {dimension_numbers = #tpu.dot_dimension_numbers<[1], [0], [0], [1], [0, 0, 1, 1], [], []>} : vector<128x256xbf16>, vector<256x128xbf16>, vector<128x128xf32> -> vector<128x128xf32>
    %c0_3 = arith.constant 0 : index
    %c0_4 = arith.constant 0 : index
    %3 = vector.load %arg4[%c0_3, %c0_4] : memref<1x128xf32, #tpu.memory_space<vmem>>, vector<1x128xf32>
    %4 = vector.broadcast %3 : vector<1x128xf32> to vector<128x128xf32>
    %5 = arith.mulf %2, %4 : vector<128x128xf32>
    %c0_5 = arith.constant 0 : index
    %c0_6 = arith.constant 0 : index
    %6 = vector.load %arg5[%c0_5, %c0_6] : memref<1x128xf32, #tpu.memory_space<vmem>>, vector<1x128xf32>
    %7 = vector.broadcast %6 : vector<1x128xf32> to vector<128x128xf32>
    %8 = arith.addf %5, %7 : vector<128x128xf32>
    %cst_7 = arith.constant 0.000000e+00 : f32
    %9 = vector.broadcast %cst_7 : f32 to vector<128x128xf32>
    %10 = arith.cmpf oge, %8, %9 : vector<128x128xf32>
    %cst_8 = arith.constant 2.000000e-01 : f32
    %11 = vector.broadcast %cst_8 : f32 to vector<128x128xf32>
    %12 = arith.mulf %11, %8 : vector<128x128xf32>
    %13 = arith.select %10, %8, %12 : vector<128x128xi1>, vector<128x128xf32>
    %c0_9 = arith.constant 0 : index
    %c0_10 = arith.constant 0 : index
    %14 = vector.load %arg6[%c0_9, %c0_10] : memref<128x128xf32, #tpu.memory_space<vmem>>, vector<128x128xf32>
    tpu.vector_store %arg6[%c0_9, %c0_10], %13 {strides = array<i32>} : memref<128x128xf32, #tpu.memory_space<vmem>>, vector<128x128xf32>,
    return
  }
  func.func @transform_0(%arg0: i32, %arg1: i32) -> (i32, i32) {
    %c0_i32 = arith.constant 0 : i32
    return %arg0, %arg1 : i32, i32
  }
  func.func @transform_1(%arg0: i32, %arg1: i32) -> (i32, i32) {
    %c0_i32 = arith.constant 0 : i32
    %c0_i32_0 = arith.constant 0 : i32
    return %arg1, %c0_i32 : i32, i32
  }
  func.func @transform_2(%arg0: i32, %arg1: i32) -> (i32, i32) {
    %c0_i32 = arith.constant 0 : i32
    %c0_i32_0 = arith.constant 0 : i32
    %c0_i32_1 = arith.constant 0 : i32
    return %c0_i32, %c0_i32_0 : i32, i32
  }
  func.func @transform_3(%arg0: i32, %arg1: i32) -> (i32, i32) {
    %c0_i32 = arith.constant 0 : i32
    %c0_i32_0 = arith.constant 0 : i32
    %c0_i32_1 = arith.constant 0 : i32
    return %c0_i32, %c0_i32_0 : i32, i32
  }
  func.func @transform_4(%arg0: i32, %arg1: i32) -> (i32, i32) {
    %c0_i32 = arith.constant 0 : i32
    %c0_i32_0 = arith.constant 0 : i32
    return %arg0, %c0_i32 : i32, i32
  }
}

module attributes {stable_mosaic.version = 11 : i64} {
  func.func @_conv_mm_kernel(%arg0: i32, %arg1: i32, %arg2: memref<32x512xbf16, #tpu.memory_space<vmem>>, %arg3: memref<512x128xbf16, #tpu.memory_space<vmem>>, %arg4: memref<1x128xf32, #tpu.memory_space<vmem>>, %arg5: memref<1x128xf32, #tpu.memory_space<vmem>>, %arg6: memref<32x128xf32, #tpu.memory_space<vmem>>) attributes {dimension_semantics = [#tpu.dimension_semantics<parallel>, #tpu.dimension_semantics<arbitrary>], iteration_bounds = array<i64: 1, 1>, scalar_prefetch = 0 : i64, scratch_operands = 0 : i64, tpu.core_type = #tpu.core_type<tc>, window_params = [{transform_indices = @transform_0, window_bounds = array<i64: 32, 512>}, {transform_indices = @transform_1, window_bounds = array<i64: 512, 128>}, {pipeline_mode = #tpu.pipeline_mode<synchronous>, transform_indices = @transform_2, window_bounds = array<i64: 1, 128>}, {pipeline_mode = #tpu.pipeline_mode<synchronous>, transform_indices = @transform_3, window_bounds = array<i64: 1, 128>}, {transform_indices = @transform_4, window_bounds = array<i64: 32, 128>}]} {
    %c0 = arith.constant 0 : index
    %c0_0 = arith.constant 0 : index
    %0 = vector.load %arg2[%c0, %c0_0] : memref<32x512xbf16, #tpu.memory_space<vmem>>, vector<32x512xbf16>
    %c0_1 = arith.constant 0 : index
    %c0_2 = arith.constant 0 : index
    %1 = vector.load %arg3[%c0_1, %c0_2] : memref<512x128xbf16, #tpu.memory_space<vmem>>, vector<512x128xbf16>
    %cst = arith.constant dense<0.000000e+00> : vector<32x128xf32>
    %2 = tpu.matmul %0, %1, %cst {dimension_numbers = #tpu.dot_dimension_numbers<[1], [0], [0], [1], [0, 0, 1, 1], [], []>} : vector<32x512xbf16>, vector<512x128xbf16>, vector<32x128xf32> -> vector<32x128xf32>
    %c0_3 = arith.constant 0 : index
    %c0_4 = arith.constant 0 : index
    %3 = vector.load %arg4[%c0_3, %c0_4] : memref<1x128xf32, #tpu.memory_space<vmem>>, vector<1x128xf32>
    %4 = vector.broadcast %3 : vector<1x128xf32> to vector<32x128xf32>
    %5 = arith.mulf %2, %4 : vector<32x128xf32>
    %c0_5 = arith.constant 0 : index
    %c0_6 = arith.constant 0 : index
    %6 = vector.load %arg5[%c0_5, %c0_6] : memref<1x128xf32, #tpu.memory_space<vmem>>, vector<1x128xf32>
    %7 = vector.broadcast %6 : vector<1x128xf32> to vector<32x128xf32>
    %8 = arith.addf %5, %7 : vector<32x128xf32>
    %cst_7 = arith.constant 0.000000e+00 : f32
    %9 = vector.broadcast %cst_7 : f32 to vector<32x128xf32>
    %10 = arith.cmpf oge, %8, %9 : vector<32x128xf32>
    %cst_8 = arith.constant 2.000000e-01 : f32
    %11 = vector.broadcast %cst_8 : f32 to vector<32x128xf32>
    %12 = arith.mulf %11, %8 : vector<32x128xf32>
    %13 = arith.select %10, %8, %12 : vector<32x128xi1>, vector<32x128xf32>
    %c0_9 = arith.constant 0 : index
    %c0_10 = arith.constant 0 : index
    %14 = vector.load %arg6[%c0_9, %c0_10] : memref<32x128xf32, #tpu.memory_space<vmem>>, vector<32x128xf32>
    tpu.vector_store %arg6[%c0_9, %c0_10], %13 {strides = array<i32>} : memref<32x128xf32, #tpu.memory_space<vmem>>, vector<32x128xf32>,
    return
  }
  func.func @transform_0(%arg0: i32, %arg1: i32) -> (i32, i32) {
    %c0_i32 = arith.constant 0 : i32
    return %arg0, %arg1 : i32, i32
  }
  func.func @transform_1(%arg0: i32, %arg1: i32) -> (i32, i32) {
    %c0_i32 = arith.constant 0 : i32
    %c0_i32_0 = arith.constant 0 : i32
    return %arg1, %c0_i32 : i32, i32
  }
  func.func @transform_2(%arg0: i32, %arg1: i32) -> (i32, i32) {
    %c0_i32 = arith.constant 0 : i32
    %c0_i32_0 = arith.constant 0 : i32
    %c0_i32_1 = arith.constant 0 : i32
    return %c0_i32, %c0_i32_0 : i32, i32
  }
  func.func @transform_3(%arg0: i32, %arg1: i32) -> (i32, i32) {
    %c0_i32 = arith.constant 0 : i32
    %c0_i32_0 = arith.constant 0 : i32
    %c0_i32_1 = arith.constant 0 : i32
    return %c0_i32, %c0_i32_0 : i32, i32
  }
  func.func @transform_4(%arg0: i32, %arg1: i32) -> (i32, i32) {
    %c0_i32 = arith.constant 0 : i32
    %c0_i32_0 = arith.constant 0 : i32
    return %arg0, %c0_i32 : i32, i32
  }
}

module attributes {stable_mosaic.version = 11 : i64} {
  func.func @_conv_mm_kernel(%arg0: i32, %arg1: i32, %arg2: memref<32x1024xbf16, #tpu.memory_space<vmem>>, %arg3: memref<1024x128xbf16, #tpu.memory_space<vmem>>, %arg4: memref<1x128xf32, #tpu.memory_space<vmem>>, %arg5: memref<1x128xf32, #tpu.memory_space<vmem>>, %arg6: memref<32x128xf32, #tpu.memory_space<vmem>>) attributes {dimension_semantics = [#tpu.dimension_semantics<parallel>, #tpu.dimension_semantics<arbitrary>], iteration_bounds = array<i64: 1, 1>, scalar_prefetch = 0 : i64, scratch_operands = 0 : i64, tpu.core_type = #tpu.core_type<tc>, window_params = [{transform_indices = @transform_0, window_bounds = array<i64: 32, 1024>}, {transform_indices = @transform_1, window_bounds = array<i64: 1024, 128>}, {pipeline_mode = #tpu.pipeline_mode<synchronous>, transform_indices = @transform_2, window_bounds = array<i64: 1, 128>}, {pipeline_mode = #tpu.pipeline_mode<synchronous>, transform_indices = @transform_3, window_bounds = array<i64: 1, 128>}, {transform_indices = @transform_4, window_bounds = array<i64: 32, 128>}]} {
    %c0 = arith.constant 0 : index
    %c0_0 = arith.constant 0 : index
    %0 = vector.load %arg2[%c0, %c0_0] : memref<32x1024xbf16, #tpu.memory_space<vmem>>, vector<32x1024xbf16>
    %c0_1 = arith.constant 0 : index
    %c0_2 = arith.constant 0 : index
    %1 = vector.load %arg3[%c0_1, %c0_2] : memref<1024x128xbf16, #tpu.memory_space<vmem>>, vector<1024x128xbf16>
    %cst = arith.constant dense<0.000000e+00> : vector<32x128xf32>
    %2 = tpu.matmul %0, %1, %cst {dimension_numbers = #tpu.dot_dimension_numbers<[1], [0], [0], [1], [0, 0, 1, 1], [], []>} : vector<32x1024xbf16>, vector<1024x128xbf16>, vector<32x128xf32> -> vector<32x128xf32>
    %c0_3 = arith.constant 0 : index
    %c0_4 = arith.constant 0 : index
    %3 = vector.load %arg4[%c0_3, %c0_4] : memref<1x128xf32, #tpu.memory_space<vmem>>, vector<1x128xf32>
    %4 = vector.broadcast %3 : vector<1x128xf32> to vector<32x128xf32>
    %5 = arith.mulf %2, %4 : vector<32x128xf32>
    %c0_5 = arith.constant 0 : index
    %c0_6 = arith.constant 0 : index
    %6 = vector.load %arg5[%c0_5, %c0_6] : memref<1x128xf32, #tpu.memory_space<vmem>>, vector<1x128xf32>
    %7 = vector.broadcast %6 : vector<1x128xf32> to vector<32x128xf32>
    %8 = arith.addf %5, %7 : vector<32x128xf32>
    %cst_7 = arith.constant 0.000000e+00 : f32
    %9 = vector.broadcast %cst_7 : f32 to vector<32x128xf32>
    %10 = arith.cmpf oge, %8, %9 : vector<32x128xf32>
    %cst_8 = arith.constant 2.000000e-01 : f32
    %11 = vector.broadcast %cst_8 : f32 to vector<32x128xf32>
    %12 = arith.mulf %11, %8 : vector<32x128xf32>
    %13 = arith.select %10, %8, %12 : vector<32x128xi1>, vector<32x128xf32>
    %c0_9 = arith.constant 0 : index
    %c0_10 = arith.constant 0 : index
    %14 = vector.load %arg6[%c0_9, %c0_10] : memref<32x128xf32, #tpu.memory_space<vmem>>, vector<32x128xf32>
    tpu.vector_store %arg6[%c0_9, %c0_10], %13 {strides = array<i32>} : memref<32x128xf32, #tpu.memory_space<vmem>>, vector<32x128xf32>,
    return
  }
  func.func @transform_0(%arg0: i32, %arg1: i32) -> (i32, i32) {
    %c0_i32 = arith.constant 0 : i32
    return %arg0, %arg1 : i32, i32
  }
  func.func @transform_1(%arg0: i32, %arg1: i32) -> (i32, i32) {
    %c0_i32 = arith.constant 0 : i32
    %c0_i32_0 = arith.constant 0 : i32
    return %arg1, %c0_i32 : i32, i32
  }
  func.func @transform_2(%arg0: i32, %arg1: i32) -> (i32, i32) {
    %c0_i32 = arith.constant 0 : i32
    %c0_i32_0 = arith.constant 0 : i32
    %c0_i32_1 = arith.constant 0 : i32
    return %c0_i32, %c0_i32_0 : i32, i32
  }
  func.func @transform_3(%arg0: i32, %arg1: i32) -> (i32, i32) {
    %c0_i32 = arith.constant 0 : i32
    %c0_i32_0 = arith.constant 0 : i32
    %c0_i32_1 = arith.constant 0 : i32
    return %c0_i32, %c0_i32_0 : i32, i32
  }
  func.func @transform_4(%arg0: i32, %arg1: i32) -> (i32, i32) {
    %c0_i32 = arith.constant 0 : i32
    %c0_i32_0 = arith.constant 0 : i32
    return %arg0, %c0_i32 : i32, i32
  }
}

module attributes {stable_mosaic.version = 11 : i64} {
  func.func @_conv_mm_kernel(%arg0: i32, %arg1: i32, %arg2: memref<16x2048xbf16, #tpu.memory_space<vmem>>, %arg3: memref<2048x128xbf16, #tpu.memory_space<vmem>>, %arg4: memref<1x128xf32, #tpu.memory_space<vmem>>, %arg5: memref<1x128xf32, #tpu.memory_space<vmem>>, %arg6: memref<16x128xf32, #tpu.memory_space<vmem>>) attributes {dimension_semantics = [#tpu.dimension_semantics<parallel>, #tpu.dimension_semantics<arbitrary>], iteration_bounds = array<i64: 1, 1>, scalar_prefetch = 0 : i64, scratch_operands = 0 : i64, tpu.core_type = #tpu.core_type<tc>, window_params = [{transform_indices = @transform_0, window_bounds = array<i64: 16, 2048>}, {transform_indices = @transform_1, window_bounds = array<i64: 2048, 128>}, {pipeline_mode = #tpu.pipeline_mode<synchronous>, transform_indices = @transform_2, window_bounds = array<i64: 1, 128>}, {pipeline_mode = #tpu.pipeline_mode<synchronous>, transform_indices = @transform_3, window_bounds = array<i64: 1, 128>}, {transform_indices = @transform_4, window_bounds = array<i64: 16, 128>}]} {
    %c0 = arith.constant 0 : index
    %c0_0 = arith.constant 0 : index
    %0 = vector.load %arg2[%c0, %c0_0] : memref<16x2048xbf16, #tpu.memory_space<vmem>>, vector<16x2048xbf16>
    %c0_1 = arith.constant 0 : index
    %c0_2 = arith.constant 0 : index
    %1 = vector.load %arg3[%c0_1, %c0_2] : memref<2048x128xbf16, #tpu.memory_space<vmem>>, vector<2048x128xbf16>
    %cst = arith.constant dense<0.000000e+00> : vector<16x128xf32>
    %2 = tpu.matmul %0, %1, %cst {dimension_numbers = #tpu.dot_dimension_numbers<[1], [0], [0], [1], [0, 0, 1, 1], [], []>} : vector<16x2048xbf16>, vector<2048x128xbf16>, vector<16x128xf32> -> vector<16x128xf32>
    %c0_3 = arith.constant 0 : index
    %c0_4 = arith.constant 0 : index
    %3 = vector.load %arg4[%c0_3, %c0_4] : memref<1x128xf32, #tpu.memory_space<vmem>>, vector<1x128xf32>
    %4 = vector.broadcast %3 : vector<1x128xf32> to vector<16x128xf32>
    %5 = arith.mulf %2, %4 : vector<16x128xf32>
    %c0_5 = arith.constant 0 : index
    %c0_6 = arith.constant 0 : index
    %6 = vector.load %arg5[%c0_5, %c0_6] : memref<1x128xf32, #tpu.memory_space<vmem>>, vector<1x128xf32>
    %7 = vector.broadcast %6 : vector<1x128xf32> to vector<16x128xf32>
    %8 = arith.addf %5, %7 : vector<16x128xf32>
    %c0_7 = arith.constant 0 : index
    %c0_8 = arith.constant 0 : index
    %9 = vector.load %arg6[%c0_7, %c0_8] : memref<16x128xf32, #tpu.memory_space<vmem>>, vector<16x128xf32>
    tpu.vector_store %arg6[%c0_7, %c0_8], %8 {strides = array<i32>} : memref<16x128xf32, #tpu.memory_space<vmem>>, vector<16x128xf32>,
    return
  }
  func.func @transform_0(%arg0: i32, %arg1: i32) -> (i32, i32) {
    %c0_i32 = arith.constant 0 : i32
    return %arg0, %arg1 : i32, i32
  }
  func.func @transform_1(%arg0: i32, %arg1: i32) -> (i32, i32) {
    %c0_i32 = arith.constant 0 : i32
    %c0_i32_0 = arith.constant 0 : i32
    return %arg1, %c0_i32 : i32, i32
  }
  func.func @transform_2(%arg0: i32, %arg1: i32) -> (i32, i32) {
    %c0_i32 = arith.constant 0 : i32
    %c0_i32_0 = arith.constant 0 : i32
    %c0_i32_1 = arith.constant 0 : i32
    return %c0_i32, %c0_i32_0 : i32, i32
  }
  func.func @transform_3(%arg0: i32, %arg1: i32) -> (i32, i32) {
    %c0_i32 = arith.constant 0 : i32
    %c0_i32_0 = arith.constant 0 : i32
    %c0_i32_1 = arith.constant 0 : i32
    return %c0_i32, %c0_i32_0 : i32, i32
  }
  func.func @transform_4(%arg0: i32, %arg1: i32) -> (i32, i32) {
    %c0_i32 = arith.constant 0 : i32
    %c0_i32_0 = arith.constant 0 : i32
    return %arg0, %c0_i32 : i32, i32
  }
}

</mosaic_0001>

<bundles_post_ra>
// kernel: forward.5
= control target key start
LH: loop header
LB: loop body
LE: loop exit
PB: predicated region body
PF: predicated region fallthrough
CT: control target
= control target key end

     0   :  { %s1112_s15 = smov 0   ;;  %s1114_s16 = smov 0   ;;  %s1299_s0 = inlined_call_operand.vmem [shape: bf16[512,128], index: 0, kind: input, shape index: {}]   ;;  %s1300_s1 = inlined_call_operand.vmem [shape: bf16[128,128], index: 1, kind: input, shape index: {}]   ;;  %s1301_s2 = inlined_call_operand.vmem [shape: f32[1,128], index: 2, kind: input, shape index: {}]   ;;  %s1302_s3 = inlined_call_operand.vmem [shape: f32[1,128], index: 3, kind: input, shape index: {}]   ;;  %s1303_s4 = inlined_call_operand.vmem [shape: f32[512,128], index: 4, kind: output, shape index: {}]  }
   0x1   :  { %s1116_s17 = smov 0  }
   0x2 LB: > { %s26_s18 = sadd.s32 1, %s1081_s16  ;;  %p894_p0 = scmp.ge.s32.totalorder %s1085_s17, 1  ;;  %s1085_s17 = sphi %s1116_s17, %s14_s17   ;;  %s1081_s16 = sphi %s1114_s16, %s1305_s16   ;;  %s1077_s15 = sphi %s1112_s15, %s1304_s15  }
   0x3   : > { %p28_p1 = scmp.ge.s32.totalorder %s26_s18, 2  ;;  %p191_p2 = scmp.lt.s32.totalorder %s1085_s17, 3 }
   0x5   : > { %s1307_s18 = smov (%p28_p1, %s26_s18), 0  ;;  %p192_p3 = pnand %p894_p0, %p191_p2 }
   0x6   : > { %s895_s21 = sshll.u32 (!%p192_p3), %s1077_s15, 5 }
   0x7   : > { %195 = sbr.rel (%p192_p3) target bundleno = 283 (0x11b), region = 36  ;;  %p226_p4 = scmp.lt.s32.totalorder (!%p192_p3), %s895_s21, 63 }
   0xc   : > { %v1039_v0 = vld [vmem:[%s1300_s1 + $0x38] sm:$0xff]   ;;  %v1040_v1 = vld [vmem:[%s1300_s1 + $0x30] sm:$0xff]   ;;  %s1309_s21 = smov (!%p226_p4, %s895_s21), 63  ;;  %v1041_v2 = vld [vmem:[%s1300_s1 + $0x28] sm:$0xff]  }
   0xd   : > { %951 = vmatprep.subr.bf16.mxu0 %v1039_v0  ;;  %999 = vmatprep.subr.bf16.mxu1 %v1039_v0  ;;  %s896_s26 = sshll.u32 %s1309_s21, 2  ;;  %v1042_v3 = vld [vmem:[%s1300_s1 + $0x20] sm:$0xff]   ;;  %v1043_v6 = vld [vmem:[%s1300_s1 + $0x18] sm:$0xff]   ;;  %v1044_v7 = vld [vmem:[%s1300_s1 + $0x10] sm:$0xff]   ;;  %s898_s22 = sshll.u32 %s1309_s21, 3 }
   0xe   : > { %952 = vmatpush3.bf16.msra.mxu0 %v1039_v0  ;;  %1007 = vmatpush3.bf16.msra.mxu1 %v1039_v0  ;;  %s1145_s29 = scalar_lea.vmem %s1299_s0, %s896_s26  ;;  %v1045_v8 = vld [vmem:[%s1300_s1 + $0x8] sm:$0xff]   ;;  %v1046_v9 = vld [vmem:[%s1300_s1] sm:$0xff]   ;;  %s1198_s25 = scalar_lea.vmem %s1303_s4, %s898_s22 }
   0xf   : > { %953 = vmatprep.subr.bf16.mxu0 %v1040_v1  ;;  %1000 = vmatprep.subr.bf16.mxu1 %v1040_v1  ;;  %v1047_v4 = vld [vmem:[%s1145_s29] sm:$0xff]   ;;  %v1049_v10 = vld [vmem:[%s1145_s29 + $0x8] sm:$0xff]   ;;  %v1051_v12 = vld [vmem:[%s1145_s29 + $0x10] sm:$0xff]  }
  0x10   : > { %v1048_v5 = vld [vmem:[%s1145_s29 + $0x40] sm:$0xff]   ;;  %967 = vmatprep.mubr.bf16.mxu0 %v1047_v4  ;;  %v1050_v11 = vld [vmem:[%s1145_s29 + $0x48] sm:$0xff]   ;;  %v1052_v13 = vld [vmem:[%s1145_s29 + $0x50] sm:$0xff]  }
  0x11   : > { %983 = vmatprep.mubr.bf16.mxu1 %v1048_v5  ;;  %v1053_v14 = vld [vmem:[%s1145_s29 + $0x18] sm:$0xff]   ;;  %v1055_v16 = vld [vmem:[%s1145_s29 + $0x20] sm:$0xff]   ;;  %v1057_v18 = vld [vmem:[%s1145_s29 + $0x28] sm:$0xff]  }
  0x12   : > { %954 = vmatpush3.bf16.msra.mxu0 %v1040_v1  ;;  %1008 = vmatpush3.bf16.msra.mxu1 %v1040_v1  ;;  %v1054_v15 = vld [vmem:[%s1145_s29 + $0x58] sm:$0xff]   ;;  %v1056_v17 = vld [vmem:[%s1145_s29 + $0x60] sm:$0xff]   ;;  %v1058_v19 = vld [vmem:[%s1145_s29 + $0x68] sm:$0xff]  }
  0x13   : > { %955 = vmatprep.subr.bf16.mxu0 %v1041_v2  ;;  %1001 = vmatprep.subr.bf16.mxu1 %v1041_v2  ;;  %v1059_v20 = vld [vmem:[%s1145_s29 + $0x30] sm:$0xff]   ;;  %v1061_v22 = vld [vmem:[%s1145_s29 + $0x38] sm:$0xff]   ;;  %v1181_v24 = vld [vmem:[%s1301_s2] ss:$0 sm:$0xff] }
  0x14   : > { %v1060_v21 = vld [vmem:[%s1145_s29 + $0x70] sm:$0xff]   ;;  %v1062_v23 = vld [vmem:[%s1145_s29 + $0x78] sm:$0xff]   ;;  %v1186_v26 = vld [vmem:[%s1302_s3] ss:$0 sm:$0xff] }
  0x16   : > { %956 = vmatpush3.bf16.msra.mxu0 %v1041_v2  ;;  %1009 = vmatpush3.bf16.msra.mxu1 %v1041_v2 }
  0x17   : > { %957 = vmatprep.subr.bf16.mxu0 %v1042_v3  ;;  %1002 = vmatprep.subr.bf16.mxu1 %v1042_v3 }
  0x1a   : > { %958 = vmatpush3.bf16.msra.mxu0 %v1042_v3  ;;  %1010 = vmatpush3.bf16.msra.mxu1 %v1042_v3 }
  0x1b   : > { %959 = vmatprep.subr.bf16.mxu0 %v1043_v6  ;;  %1003 = vmatprep.subr.bf16.mxu1 %v1043_v6 }
  0x1e   : > { %960 = vmatpush3.bf16.msra.mxu0 %v1043_v6  ;;  %1011 = vmatpush3.bf16.msra.mxu1 %v1043_v6 }
  0x1f   : > { %961 = vmatprep.subr.bf16.mxu0 %v1044_v7  ;;  %1004 = vmatprep.subr.bf16.mxu1 %v1044_v7 }
  0x22   : > { %962 = vmatpush3.bf16.msra.mxu0 %v1044_v7  ;;  %1012 = vmatpush3.bf16.msra.mxu1 %v1044_v7 }
  0x23   : > { %963 = vmatprep.subr.bf16.mxu0 %v1045_v8  ;;  %1005 = vmatprep.subr.bf16.mxu1 %v1045_v8 }
  0x26   : > { %964 = vmatpush3.bf16.msra.mxu0 %v1045_v8  ;;  %1013 = vmatpush3.bf16.msra.mxu1 %v1045_v8 }
  0x27   : > { %965 = vmatprep.subr.bf16.mxu0 %v1046_v9  ;;  %1006 = vmatprep.subr.bf16.mxu1 %v1046_v9 }
  0x2a   : > { %966 = vmatpush3.bf16.msra.mxu0 %v1046_v9  ;;  %1014 = vmatpush3.bf16.msra.mxu1 %v1046_v9 }
  0x2d   : > { %968 = vmatmul.mubr.bf16.vlgmr.msra.gmra.mxu0 %v1049_v10  ;;  %984 = vmatmul.mubr.bf16.vlgmr.msra.gmra.mxu1 %v1050_v11 }
  0x2e   : > { %971 = vmatprep.mubr.bf16.mxu0 %v1051_v12  ;;  %987 = vmatprep.mubr.bf16.mxu1 %v1052_v13 }
  0x35   : > { %972 = vmatmul.mubr.bf16.gmra.mxu0 %v1053_v14  ;;  %988 = vmatmul.mubr.bf16.gmra.mxu1 %v1054_v15 }
  0x36   : > { %975 = vmatprep.mubr.bf16.mxu0 %v1055_v16  ;;  %991 = vmatprep.mubr.bf16.mxu1 %v1056_v17 }
  0x3d   : > { %976 = vmatmul.mubr.bf16.gmra.mxu0 %v1057_v18  ;;  %992 = vmatmul.mubr.bf16.gmra.mxu1 %v1058_v19 }
  0x3e   : > { %979 = vmatprep.mubr.bf16.mxu0 %v1059_v20  ;;  %995 = vmatprep.mubr.bf16.mxu1 %v1060_v21 }
  0x45   : > { %980 = vmatmul.mubr.bf16.gmra.mxu0 %v1061_v22  ;;  %996 = vmatmul.mubr.bf16.gmra.mxu1 %v1062_v23 }
  0xed   : > { %v969_v25 = vpop.f32.mrf.mxu0  ;;  %v985_v27 = vpop.f32.mrf.mxu1 }
  0xee   : > { %v609_v28 = vmul.f32 %v969_v25, %v1181_v24  ;;  %v625_v29 = vmul.f32 %v985_v27, %v1181_v24 }
  0xef   : > { %v473_v30 = vpop.f32.mrf.mxu0  ;;  %v537_v31 = vpop.f32.mrf.mxu1 }
  0xf0   : > { %v648_v32 = vadd.f32 %v1186_v26, %v609_v28  ;;  %v664_v33 = vadd.f32 %v1186_v26, %v625_v29  ;;  %v607_v34 = vmul.f32 %v1181_v24, %v473_v30  ;;  %v623_v35 = vmul.f32 %v1181_v24, %v537_v31 }
  0xf1   : > { %v970_v36 = vpop.f32.mrf.mxu0  ;;  %v986_v37 = vpop.f32.mrf.mxu1 }
  0xf2   : > { %vm680_vm0 = vcmp.ge.f32.partialorder %v648_v32, 0.0  ;;  %v712_v38 = vmul.f32 0.2, %v648_v32  ;;  %vm696_vm1 = vcmp.ge.f32.partialorder %v664_v33, 0.0  ;;  %v728_v39 = vmul.f32 0.2, %v664_v33 }
  0xf3   : > { %v646_v40 = vadd.f32 %v1186_v26, %v607_v34  ;;  %v662_v41 = vadd.f32 %v1186_v26, %v623_v35  ;;  %v610_v42 = vmul.f32 %v970_v36, %v1181_v24  ;;  %v626_v43 = vmul.f32 %v986_v37, %v1181_v24  ;;  %v476_v44 = vpop.f32.mrf.mxu0  ;;  %v540_v45 = vpop.f32.mrf.mxu1 }
  0xf4   : > { %v744_v46 = vsel %vm680_vm0, %v648_v32, %v712_v38  ;;  %v760_v47 = vsel %vm696_vm1, %v664_v33, %v728_v39  ;;  %v608_v48 = vmul.f32 %v1181_v24, %v476_v44  ;;  %v624_v49 = vmul.f32 %v1181_v24, %v540_v45 }
  0xf5   : > { %776 = vst [vmem:[%s1198_s25 + $0x10] sm:$0xff] %v744_v46  ;;  %792 = vst [vmem:[%s1198_s25 + $0x90] sm:$0xff] %v760_v47  ;;  %vm678_vm2 = vcmp.ge.f32.partialorder %v646_v40, 0.0  ;;  %v710_v50 = vmul.f32 0.2, %v646_v40  ;;  %vm694_vm3 = vcmp.ge.f32.partialorder %v662_v41, 0.0  ;;  %v973_v52 = vpop.f32.mrf.mxu0  ;;  %v989_v53 = vpop.f32.mrf.mxu1  ;;  %v649_v54 = vadd.f32 %v1186_v26, %v610_v42 }
  0xf6   : > { %v726_v51 = vmul.f32 0.2, %v662_v41  ;;  %v665_v55 = vadd.f32 %v1186_v26, %v626_v43  ;;  %v647_v56 = vadd.f32 %v1186_v26, %v608_v48  ;;  %v663_v57 = vadd.f32 %v1186_v26, %v624_v49 }
  0xf7   : > { %v742_v58 = vsel %vm678_vm2, %v646_v40, %v710_v50  ;;  %v613_v60 = vmul.f32 %v973_v52, %v1181_v24  ;;  %v629_v61 = vmul.f32 %v989_v53, %v1181_v24  ;;  %v489_v62 = vpop.f32.mrf.mxu0  ;;  %v553_v63 = vpop.f32.mrf.mxu1  ;;  %vm681_vm4 = vcmp.ge.f32.partialorder %v649_v54, 0.0 }
  0xf8   : > { %v758_v59 = vsel %vm694_vm3, %v662_v41, %v726_v51  ;;  %774 = vst [vmem:[%s1198_s25] sm:$0xff] %v742_v58  ;;  %v713_v0 = vmul.f32 0.2, %v649_v54  ;;  %vm697_vm5 = vcmp.ge.f32.partialorder %v665_v55, 0.0  ;;  %v729_v1 = vmul.f32 0.2, %v665_v55 }
  0xf9   : > { %790 = vst [vmem:[%s1198_s25 + $0x80] sm:$0xff] %v758_v59  ;;  %vm679_vm6 = vcmp.ge.f32.partialorder %v647_v56, 0.0  ;;  %v711_v2 = vmul.f32 0.2, %v647_v56  ;;  %vm695_vm7 = vcmp.ge.f32.partialorder %v663_v57, 0.0  ;;  %v974_v4 = vpop.f32.mrf.mxu0  ;;  %v990_v5 = vpop.f32.mrf.mxu1  ;;  %v652_v8 = vadd.f32 %v1186_v26, %v613_v60 }
  0xfa   : > { %v727_v3 = vmul.f32 0.2, %v663_v57  ;;  %v745_v6 = vsel %vm681_vm4, %v649_v54, %v713_v0  ;;  %v761_v7 = vsel %vm697_vm5, %v665_v55, %v729_v1  ;;  %v668_v9 = vadd.f32 %v1186_v26, %v629_v61 }
  0xfb   : > { %777 = vst [vmem:[%s1198_s25 + $0x18] sm:$0xff] %v745_v6  ;;  %793 = vst [vmem:[%s1198_s25 + $0x98] sm:$0xff] %v761_v7  ;;  %v743_v10 = vsel %vm679_vm6, %v647_v56, %v711_v2  ;;  %v611_v12 = vmul.f32 %v1181_v24, %v489_v62  ;;  %v627_v13 = vmul.f32 %v1181_v24, %v553_v63  ;;  %v492_v14 = vpop.f32.mrf.mxu0  ;;  %v556_v15 = vpop.f32.mrf.mxu1  ;;  %vm684_vm8 = vcmp.ge.f32.partialorder %v652_v8, 0.0 }
  0xfc   : > { %v759_v11 = vsel %vm695_vm7, %v663_v57, %v727_v3  ;;  %775 = vst [vmem:[%s1198_s25 + $0x8] sm:$0xff] %v743_v10  ;;  %v716_v16 = vmul.f32 0.2, %v652_v8  ;;  %vm700_vm9 = vcmp.ge.f32.partialorder %v668_v9, 0.0  ;;  %v732_v17 = vmul.f32 0.2, %v668_v9 }
  0xfd   : > { %791 = vst [vmem:[%s1198_s25 + $0x88] sm:$0xff] %v759_v11  ;;  %v650_v18 = vadd.f32 %v1186_v26, %v611_v12  ;;  %v666_v19 = vadd.f32 %v1186_v26, %v627_v13  ;;  %v614_v20 = vmul.f32 %v974_v4, %v1181_v24  ;;  %v630_v21 = vmul.f32 %v990_v5, %v1181_v24  ;;  %v977_v22 = vpop.f32.mrf.mxu0  ;;  %v993_v23 = vpop.f32.mrf.mxu1 }
  0xfe   : > { %v748_v25 = vsel %vm684_vm8, %v652_v8, %v716_v16  ;;  %v764_v27 = vsel %vm700_vm9, %v668_v9, %v732_v17  ;;  %v612_v28 = vmul.f32 %v1181_v24, %v492_v14  ;;  %v628_v29 = vmul.f32 %v1181_v24, %v556_v15 }
  0xff   : > { %780 = vst [vmem:[%s1198_s25 + $0x30] sm:$0xff] %v748_v25  ;;  %796 = vst [vmem:[%s1198_s25 + $0xb0] sm:$0xff] %v764_v27  ;;  %vm682_vm10 = vcmp.ge.f32.partialorder %v650_v18, 0.0  ;;  %v714_v30 = vmul.f32 0.2, %v650_v18  ;;  %vm698_vm11 = vcmp.ge.f32.partialorder %v666_v19, 0.0  ;;  %v505_v32 = vpop.f32.mrf.mxu0  ;;  %v569_v33 = vpop.f32.mrf.mxu1  ;;  %v653_v34 = vadd.f32 %v1186_v26, %v614_v20 }
 0x100   : > { %v730_v31 = vmul.f32 0.2, %v666_v19  ;;  %v669_v35 = vadd.f32 %v1186_v26, %v630_v21  ;;  %v651_v36 = vadd.f32 %v1186_v26, %v612_v28  ;;  %v667_v37 = vadd.f32 %v1186_v26, %v628_v29 }
 0x101   : > { %v746_v38 = vsel %vm682_vm10, %v650_v18, %v714_v30  ;;  %v617_v40 = vmul.f32 %v977_v22, %v1181_v24  ;;  %v633_v41 = vmul.f32 %v993_v23, %v1181_v24  ;;  %v978_v42 = vpop.f32.mrf.mxu0  ;;  %v994_v43 = vpop.f32.mrf.mxu1  ;;  %vm685_vm12 = vcmp.ge.f32.partialorder %v653_v34, 0.0 }
 0x102   : > { %v762_v39 = vsel %vm698_vm11, %v666_v19, %v730_v31  ;;  %778 = vst [vmem:[%s1198_s25 + $0x20] sm:$0xff] %v746_v38  ;;  %v717_v44 = vmul.f32 0.2, %v653_v34  ;;  %vm701_vm13 = vcmp.ge.f32.partialorder %v669_v35, 0.0  ;;  %v733_v45 = vmul.f32 0.2, %v669_v35 }
 0x103   : > { %794 = vst [vmem:[%s1198_s25 + $0xa0] sm:$0xff] %v762_v39  ;;  %vm683_vm14 = vcmp.ge.f32.partialorder %v651_v36, 0.0  ;;  %v715_v46 = vmul.f32 0.2, %v651_v36  ;;  %vm699_vm15 = vcmp.ge.f32.partialorder %v667_v37, 0.0  ;;  %v508_v48 = vpop.f32.mrf.mxu0  ;;  %v572_v49 = vpop.f32.mrf.mxu1  ;;  %v656_v52 = vadd.f32 %v1186_v26, %v617_v40 }
 0x104   : > { %v731_v47 = vmul.f32 0.2, %v667_v37  ;;  %v749_v50 = vsel %vm685_vm12, %v653_v34, %v717_v44  ;;  %v765_v51 = vsel %vm701_vm13, %v669_v35, %v733_v45  ;;  %v672_v53 = vadd.f32 %v1186_v26, %v633_v41 }
 0x105   : > { %781 = vst [vmem:[%s1198_s25 + $0x38] sm:$0xff] %v749_v50  ;;  %797 = vst [vmem:[%s1198_s25 + $0xb8] sm:$0xff] %v765_v51  ;;  %v747_v54 = vsel %vm683_vm14, %v651_v36, %v715_v46  ;;  %v615_v56 = vmul.f32 %v1181_v24, %v505_v32  ;;  %v631_v57 = vmul.f32 %v1181_v24, %v569_v33  ;;  %v981_v58 = vpop.f32.mrf.mxu0  ;;  %v997_v59 = vpop.f32.mrf.mxu1  ;;  %vm688_vm0 = vcmp.ge.f32.partialorder %v656_v52, 0.0 }
 0x106   : > { %v763_v55 = vsel %vm699_vm15, %v667_v37, %v731_v47  ;;  %779 = vst [vmem:[%s1198_s25 + $0x28] sm:$0xff] %v747_v54  ;;  %v720_v60 = vmul.f32 0.2, %v656_v52  ;;  %vm704_vm1 = vcmp.ge.f32.partialorder %v672_v53, 0.0  ;;  %v736_v61 = vmul.f32 0.2, %v672_v53 }
 0x107   : > { %795 = vst [vmem:[%s1198_s25 + $0xa8] sm:$0xff] %v763_v55  ;;  %v654_v62 = vadd.f32 %v1186_v26, %v615_v56  ;;  %v670_v63 = vadd.f32 %v1186_v26, %v631_v57  ;;  %v618_v0 = vmul.f32 %v978_v42, %v1181_v24  ;;  %v634_v1 = vmul.f32 %v994_v43, %v1181_v24  ;;  %v521_v2 = vpop.f32.mrf.mxu0  ;;  %v585_v3 = vpop.f32.mrf.mxu1 }
 0x108   : > { %v752_v4 = vsel %vm688_vm0, %v656_v52, %v720_v60  ;;  %v768_v5 = vsel %vm704_vm1, %v672_v53, %v736_v61  ;;  %v616_v6 = vmul.f32 %v1181_v24, %v508_v48  ;;  %v632_v7 = vmul.f32 %v1181_v24, %v572_v49 }
 0x109   : > { %784 = vst [vmem:[%s1198_s25 + $0x50] sm:$0xff] %v752_v4  ;;  %800 = vst [vmem:[%s1198_s25 + $0xd0] sm:$0xff] %v768_v5  ;;  %vm686_vm2 = vcmp.ge.f32.partialorder %v654_v62, 0.0  ;;  %v718_v8 = vmul.f32 0.2, %v654_v62  ;;  %vm702_vm3 = vcmp.ge.f32.partialorder %v670_v63, 0.0  ;;  %v657_v10 = vadd.f32 %v1186_v26, %v618_v0  ;;  %v982_v18 = vpop.f32.mrf.mxu0  ;;  %v998_v19 = vpop.f32.mrf.mxu1 }
 0x10a   : > { %v734_v9 = vmul.f32 0.2, %v670_v63  ;;  %v673_v11 = vadd.f32 %v1186_v26, %v634_v1  ;;  %v655_v12 = vadd.f32 %v1186_v26, %v616_v6  ;;  %v671_v13 = vadd.f32 %v1186_v26, %v632_v7 }
 0x10b   : > { %v750_v14 = vsel %vm686_vm2, %v654_v62, %v718_v8  ;;  %v621_v16 = vmul.f32 %v981_v58, %v1181_v24  ;;  %v637_v17 = vmul.f32 %v997_v59, %v1181_v24  ;;  %vm689_vm4 = vcmp.ge.f32.partialorder %v657_v10, 0.0  ;;  %v524_v34 = vpop.f32.mrf.mxu0  ;;  %v588_v35 = vpop.f32.mrf.mxu1 }
 0x10c   : > { %v766_v15 = vsel %vm702_vm3, %v670_v63, %v734_v9  ;;  %782 = vst [vmem:[%s1198_s25 + $0x40] sm:$0xff] %v750_v14  ;;  %v721_v20 = vmul.f32 0.2, %v657_v10  ;;  %vm705_vm5 = vcmp.ge.f32.partialorder %v673_v11, 0.0  ;;  %v737_v21 = vmul.f32 0.2, %v673_v11 }
 0x10d   : > { %798 = vst [vmem:[%s1198_s25 + $0xc0] sm:$0xff] %v766_v15  ;;  %vm687_vm6 = vcmp.ge.f32.partialorder %v655_v12, 0.0  ;;  %v719_v22 = vmul.f32 0.2, %v655_v12  ;;  %vm703_vm7 = vcmp.ge.f32.partialorder %v671_v13, 0.0  ;;  %v660_v28 = vadd.f32 %v1186_v26, %v621_v16 }
 0x10e   : > { %v735_v23 = vmul.f32 0.2, %v671_v13  ;;  %v753_v25 = vsel %vm689_vm4, %v657_v10, %v721_v20  ;;  %v769_v27 = vsel %vm705_vm5, %v673_v11, %v737_v21  ;;  %v676_v29 = vadd.f32 %v1186_v26, %v637_v17 }
 0x10f   : > { %785 = vst [vmem:[%s1198_s25 + $0x58] sm:$0xff] %v753_v25  ;;  %801 = vst [vmem:[%s1198_s25 + $0xd8] sm:$0xff] %v769_v27  ;;  %v751_v30 = vsel %vm687_vm6, %v655_v12, %v719_v22  ;;  %v619_v32 = vmul.f32 %v1181_v24, %v521_v2  ;;  %v635_v33 = vmul.f32 %v1181_v24, %v585_v3  ;;  %vm692_vm8 = vcmp.ge.f32.partialorder %v660_v28, 0.0 }
 0x110   : > { %v767_v31 = vsel %vm703_vm7, %v671_v13, %v735_v23  ;;  %783 = vst [vmem:[%s1198_s25 + $0x48] sm:$0xff] %v751_v30  ;;  %v724_v36 = vmul.f32 0.2, %v660_v28  ;;  %vm708_vm9 = vcmp.ge.f32.partialorder %v676_v29, 0.0  ;;  %v740_v37 = vmul.f32 0.2, %v676_v29 }
 0x111   : > { %799 = vst [vmem:[%s1198_s25 + $0xc8] sm:$0xff] %v767_v31  ;;  %v658_v38 = vadd.f32 %v1186_v26, %v619_v32  ;;  %v674_v39 = vadd.f32 %v1186_v26, %v635_v33  ;;  %v622_v40 = vmul.f32 %v982_v18, %v1181_v24  ;;  %v638_v41 = vmul.f32 %v998_v19, %v1181_v24 }
 0x112   : > { %v756_v42 = vsel %vm692_vm8, %v660_v28, %v724_v36  ;;  %v772_v43 = vsel %vm708_vm9, %v676_v29, %v740_v37  ;;  %v620_v44 = vmul.f32 %v1181_v24, %v524_v34  ;;  %v636_v45 = vmul.f32 %v1181_v24, %v588_v35 }
 0x113   : > { %788 = vst [vmem:[%s1198_s25 + $0x70] sm:$0xff] %v756_v42  ;;  %804 = vst [vmem:[%s1198_s25 + $0xf0] sm:$0xff] %v772_v43  ;;  %vm690_vm10 = vcmp.ge.f32.partialorder %v658_v38, 0.0  ;;  %v722_v46 = vmul.f32 0.2, %v658_v38  ;;  %vm706_vm11 = vcmp.ge.f32.partialorder %v674_v39, 0.0  ;;  %v661_v48 = vadd.f32 %v1186_v26, %v622_v40 }
 0x114   : > { %v738_v47 = vmul.f32 0.2, %v674_v39  ;;  %v677_v49 = vadd.f32 %v1186_v26, %v638_v41  ;;  %v659_v50 = vadd.f32 %v1186_v26, %v620_v44  ;;  %v675_v51 = vadd.f32 %v1186_v26, %v636_v45 }
 0x115   : > { %v754_v52 = vsel %vm690_vm10, %v658_v38, %v722_v46  ;;  %vm693_vm12 = vcmp.ge.f32.partialorder %v661_v48, 0.0  ;;  %v725_v24 = vmul.f32 0.2, %v661_v48 }
 0x116   : > { %v770_v53 = vsel %vm706_vm11, %v674_v39, %v738_v47  ;;  %786 = vst [vmem:[%s1198_s25 + $0x60] sm:$0xff] %v754_v52  ;;  %vm709_vm13 = vcmp.ge.f32.partialorder %v677_v49, 0.0  ;;  %v741_v54 = vmul.f32 0.2, %v677_v49  ;;  %vm691_vm14 = vcmp.ge.f32.partialorder %v659_v50, 0.0 }
 0x117   : > { %802 = vst [vmem:[%s1198_s25 + $0xe0] sm:$0xff] %v770_v53  ;;  %v723_v55 = vmul.f32 0.2, %v659_v50  ;;  %vm707_vm15 = vcmp.ge.f32.partialorder %v675_v51, 0.0  ;;  %v739_v56 = vmul.f32 0.2, %v675_v51  ;;  %v757_v57 = vsel %vm693_vm12, %v661_v48, %v725_v24 }
 0x118   : > { %v773_v58 = vsel %vm709_vm13, %v677_v49, %v741_v54  ;;  %789 = vst [vmem:[%s1198_s25 + $0x78] sm:$0xff] %v757_v57 }
 0x119   : > { %805 = vst [vmem:[%s1198_s25 + $0xf8] sm:$0xff] %v773_v58  ;;  %v755_v26 = vsel %vm691_vm14, %v659_v50, %v723_v55  ;;  %v771_v59 = vsel %vm707_vm15, %v675_v51, %v739_v56 }
 0x11a   : > { %787 = vst [vmem:[%s1198_s25 + $0x68] sm:$0xff] %v755_v26  ;;  %803 = vst [vmem:[%s1198_s25 + $0xe8] sm:$0xff] %v771_v59 }
 0x11b PF: > { %s14_s17 = sadd.s32 1, %s1085_s17   ;;  %s1304_s15 = smov %s1081_s16 }
 0x11c   : > { %p11_p5 = scmp.ge.s32.totalorder %s14_s17, 4   ;;  %s1305_s16 = smov %s1307_s18 }
 0x11e   :  { %13 = sbr.rel (!%p11_p5) target bundleno = 2 (0x2), region = 69 }

// kernel: forward.6
= control target key start
LH: loop header
LB: loop body
LE: loop exit
PB: predicated region body
PF: predicated region fallthrough
CT: control target
= control target key end

     0   :  { %s818_s1 = inlined_call_operand.vmem [shape: bf16[256,128], index: 1, kind: input, shape index: {}]   ;;  %s819_s0 = inlined_call_operand.vmem [shape: bf16[128,256], index: 0, kind: input, shape index: {}]   ;;  %s820_s2 = inlined_call_operand.vmem [shape: f32[1,128], index: 2, kind: input, shape index: {}]   ;;  %s821_s3 = inlined_call_operand.vmem [shape: f32[1,128], index: 3, kind: input, shape index: {}]   ;;  %s822_s4 = inlined_call_operand.vmem [shape: f32[128,128], index: 4, kind: output, shape index: {}]  }
   0x1   :  { %v567_v0 = vld [vmem:[%s818_s1 + $0x78] sm:$0xff]   ;;  %v569_v2 = vld [vmem:[%s818_s1 + $0x70] sm:$0xff]   ;;  %v571_v4 = vld [vmem:[%s818_s1 + $0x68] sm:$0xff]  }
   0x2   :  { %v568_v1 = vld [vmem:[%s818_s1 + $0x38] sm:$0xff]   ;;  %487 = vmatprep.subr.bf16.mxu0 %v567_v0  ;;  %551 = vmatprep.subr.bf16.mxu1 %v567_v0  ;;  %v570_v3 = vld [vmem:[%s818_s1 + $0x30] sm:$0xff]   ;;  %v572_v5 = vld [vmem:[%s818_s1 + $0x28] sm:$0xff]  }
   0x3   :  { %488 = vmatpush3.bf16.msra.mxu0 %v568_v1  ;;  %559 = vmatpush3.bf16.msra.mxu1 %v568_v1  ;;  %v573_v6 = vld [vmem:[%s818_s1 + $0x60] sm:$0xff]   ;;  %v575_v8 = vld [vmem:[%s818_s1 + $0x58] sm:$0xff]   ;;  %v577_v10 = vld [vmem:[%s818_s1 + $0x50] sm:$0xff]  }
   0x4   :  { %489 = vmatprep.subr.bf16.mxu0 %v569_v2  ;;  %552 = vmatprep.subr.bf16.mxu1 %v569_v2  ;;  %v574_v7 = vld [vmem:[%s818_s1 + $0x20] sm:$0xff]   ;;  %v576_v9 = vld [vmem:[%s818_s1 + $0x18] sm:$0xff]   ;;  %v578_v13 = vld [vmem:[%s818_s1 + $0x10] sm:$0xff]  }
   0x5   :  { %v585_v11 = vld [vmem:[%s819_s0 + $0x4] ss:$8 sps:$4 sm:$0xff]   ;;  %v583_v18 = vld [vmem:[%s819_s0] ss:$8 sps:$4 sm:$0xff]   ;;  %v589_v20 = vld [vmem:[%s819_s0 + $0x14] ss:$8 sps:$4 sm:$0xff]  }
   0x6   :  { %v588_v12 = vld [vmem:[%s819_s0 + $0x44] ss:$8 sps:$4 sm:$0xff]   ;;  %274 = vmatprep.mubr.bf16.mxu0 %v585_v11  ;;  %v586_v19 = vld [vmem:[%s819_s0 + $0x40] ss:$8 sps:$4 sm:$0xff]   ;;  %v591_v21 = vld [vmem:[%s819_s0 + $0x54] ss:$8 sps:$4 sm:$0xff]  }
   0x7   :  { %490 = vmatpush3.bf16.msra.mxu0 %v570_v3  ;;  %560 = vmatpush3.bf16.msra.mxu1 %v570_v3  ;;  %v579_v14 = vld [vmem:[%s818_s1 + $0x48] sm:$0xff]   ;;  %v581_v16 = vld [vmem:[%s818_s1 + $0x40] sm:$0xff]   ;;  %v593_v22 = vld [vmem:[%s819_s0 + $0x10] ss:$8 sps:$4 sm:$0xff]  }
   0x8   :  { %491 = vmatprep.subr.bf16.mxu0 %v571_v4  ;;  %553 = vmatprep.subr.bf16.mxu1 %v571_v4  ;;  %v580_v15 = vld [vmem:[%s818_s1 + $0x8] sm:$0xff]   ;;  %v582_v17 = vld [vmem:[%s818_s1] sm:$0xff]   ;;  %v594_v23 = vld [vmem:[%s819_s0 + $0x50] ss:$8 sps:$4 sm:$0xff]  }
   0x9   :  { %306 = vmatprep.mubr.bf16.mxu1 %v588_v12  ;;  %v595_v24 = vld [vmem:[%s819_s0 + $0x24] ss:$8 sps:$4 sm:$0xff]   ;;  %v599_v26 = vld [vmem:[%s819_s0 + $0x20] ss:$8 sps:$4 sm:$0xff]   ;;  %v601_v28 = vld [vmem:[%s819_s0 + $0x34] ss:$8 sps:$4 sm:$0xff]  }
   0xa   :  { %v597_v25 = vld [vmem:[%s819_s0 + $0x64] ss:$8 sps:$4 sm:$0xff]   ;;  %v600_v27 = vld [vmem:[%s819_s0 + $0x60] ss:$8 sps:$4 sm:$0xff]   ;;  %v603_v29 = vld [vmem:[%s819_s0 + $0x74] ss:$8 sps:$4 sm:$0xff]  }
   0xb   :  { %492 = vmatpush3.bf16.msra.mxu0 %v572_v5  ;;  %561 = vmatpush3.bf16.msra.mxu1 %v572_v5  ;;  %v605_v30 = vld [vmem:[%s819_s0 + $0x30] ss:$8 sps:$4 sm:$0xff]   ;;  %v731_v35 = vld [vmem:[%s820_s2] ss:$0 sm:$0xff] }
   0xc   :  { %493 = vmatprep.subr.bf16.mxu0 %v573_v6  ;;  %554 = vmatprep.subr.bf16.mxu1 %v573_v6  ;;  %v606_v31 = vld [vmem:[%s819_s0 + $0x70] ss:$8 sps:$4 sm:$0xff]   ;;  %v736_v39 = vld [vmem:[%s821_s3] ss:$0 sm:$0xff] }
   0xf   :  { %494 = vmatpush3.bf16.msra.mxu0 %v574_v7  ;;  %562 = vmatpush3.bf16.msra.mxu1 %v574_v7 }
  0x10   :  { %495 = vmatprep.subr.bf16.mxu0 %v575_v8  ;;  %555 = vmatprep.subr.bf16.mxu1 %v575_v8 }
  0x13   :  { %496 = vmatpush3.bf16.msra.mxu0 %v576_v9  ;;  %563 = vmatpush3.bf16.msra.mxu1 %v576_v9 }
  0x14   :  { %497 = vmatprep.subr.bf16.mxu0 %v577_v10  ;;  %556 = vmatprep.subr.bf16.mxu1 %v577_v10 }
  0x17   :  { %498 = vmatpush3.bf16.msra.mxu0 %v578_v13  ;;  %564 = vmatpush3.bf16.msra.mxu1 %v578_v13 }
  0x18   :  { %499 = vmatprep.subr.bf16.mxu0 %v579_v14  ;;  %557 = vmatprep.subr.bf16.mxu1 %v579_v14 }
  0x1b   :  { %500 = vmatpush3.bf16.msra.mxu0 %v580_v15  ;;  %565 = vmatpush3.bf16.msra.mxu1 %v580_v15 }
  0x1c   :  { %501 = vmatprep.subr.bf16.mxu0 %v581_v16  ;;  %558 = vmatprep.subr.bf16.mxu1 %v581_v16 }
  0x1f   :  { %502 = vmatpush3.bf16.msra.mxu0 %v582_v17  ;;  %566 = vmatpush3.bf16.msra.mxu1 %v582_v17 }
  0x22   :  { %275 = vmatmul.mubr.bf16.vlgmr.msra.gmra.mxu0 %v583_v18  ;;  %307 = vmatmul.mubr.bf16.vlgmr.msra.gmra.mxu1 %v586_v19 }
  0x23   :  { %282 = vmatprep.mubr.bf16.mxu0 %v589_v20  ;;  %314 = vmatprep.mubr.bf16.mxu1 %v591_v21 }
  0x2a   :  { %283 = vmatmul.mubr.bf16.gmra.mxu0 %v593_v22  ;;  %315 = vmatmul.mubr.bf16.gmra.mxu1 %v594_v23 }
  0x2b   :  { %290 = vmatprep.mubr.bf16.mxu0 %v595_v24  ;;  %322 = vmatprep.mubr.bf16.mxu1 %v597_v25 }
  0x32   :  { %291 = vmatmul.mubr.bf16.gmra.mxu0 %v599_v26  ;;  %323 = vmatmul.mubr.bf16.gmra.mxu1 %v600_v27 }
  0x33   :  { %298 = vmatprep.mubr.bf16.mxu0 %v601_v28  ;;  %330 = vmatprep.mubr.bf16.mxu1 %v603_v29 }
  0x3a   :  { %299 = vmatmul.mubr.bf16.gmra.mxu0 %v605_v30  ;;  %331 = vmatmul.mubr.bf16.gmra.mxu1 %v606_v31 }
  0xe2   :  { %v503_v32 = vpop.f32.mrf.mxu0  ;;  %v527_v33 = vpop.f32.mrf.mxu1 }
  0xe4   :  { %v504_v34 = vpop.f32.mrf.mxu0  ;;  %v528_v36 = vpop.f32.mrf.mxu1 }
  0xe5   :  { %v505_v37 = vadd.f32 %v504_v34, %v503_v32  ;;  %v529_v38 = vadd.f32 %v528_v36, %v527_v33 }
  0xe6   :  { %v506_v40 = vpop.f32.mrf.mxu0  ;;  %v530_v41 = vpop.f32.mrf.mxu1 }
  0xe7   :  { %v346_v42 = vmul.f32 %v505_v37, %v731_v35  ;;  %v354_v43 = vmul.f32 %v529_v38, %v731_v35 }
  0xe8   :  { %v507_v44 = vpop.f32.mrf.mxu0  ;;  %v531_v45 = vpop.f32.mrf.mxu1 }
  0xe9   :  { %v369_v46 = vadd.f32 %v736_v39, %v346_v42  ;;  %v377_v47 = vadd.f32 %v736_v39, %v354_v43  ;;  %v508_v48 = vadd.f32 %v507_v44, %v506_v40  ;;  %v532_v49 = vadd.f32 %v531_v45, %v530_v41 }
  0xea   :  { %v509_v50 = vpop.f32.mrf.mxu0  ;;  %v533_v51 = vpop.f32.mrf.mxu1 }
  0xeb   :  { %vm385_vm0 = vcmp.ge.f32.partialorder %v369_v46, 0.0  ;;  %v401_v52 = vmul.f32 0.2, %v369_v46  ;;  %vm393_vm1 = vcmp.ge.f32.partialorder %v377_v47, 0.0  ;;  %v409_v53 = vmul.f32 0.2, %v377_v47 }
  0xec   :  { %v347_v54 = vmul.f32 %v508_v48, %v731_v35  ;;  %v355_v55 = vmul.f32 %v532_v49, %v731_v35  ;;  %v510_v56 = vpop.f32.mrf.mxu0  ;;  %v534_v57 = vpop.f32.mrf.mxu1 }
  0xed   :  { %v417_v58 = vsel %vm385_vm0, %v369_v46, %v401_v52  ;;  %v425_v59 = vsel %vm393_vm1, %v377_v47, %v409_v53  ;;  %v511_v60 = vadd.f32 %v510_v56, %v509_v50  ;;  %v535_v61 = vadd.f32 %v534_v57, %v533_v51 }
  0xee   :  { %433 = vst [vmem:[%s822_s4] sm:$0xff] %v417_v58  ;;  %441 = vst [vmem:[%s822_s4 + $0x40] sm:$0xff] %v425_v59  ;;  %v370_v62 = vadd.f32 %v736_v39, %v347_v54  ;;  %v378_v63 = vadd.f32 %v736_v39, %v355_v55  ;;  %v512_v0 = vpop.f32.mrf.mxu0  ;;  %v536_v1 = vpop.f32.mrf.mxu1 }
  0xef   :  { %v348_v2 = vmul.f32 %v511_v60, %v731_v35  ;;  %v356_v3 = vmul.f32 %v535_v61, %v731_v35 }
  0xf0   :  { %vm386_vm2 = vcmp.ge.f32.partialorder %v370_v62, 0.0  ;;  %v402_v4 = vmul.f32 0.2, %v370_v62  ;;  %vm394_vm3 = vcmp.ge.f32.partialorder %v378_v63, 0.0  ;;  %v410_v5 = vmul.f32 0.2, %v378_v63  ;;  %v513_v6 = vpop.f32.mrf.mxu0  ;;  %v537_v7 = vpop.f32.mrf.mxu1 }
  0xf1   :  { %v371_v8 = vadd.f32 %v736_v39, %v348_v2  ;;  %v379_v9 = vadd.f32 %v736_v39, %v356_v3  ;;  %v514_v10 = vadd.f32 %v513_v6, %v512_v0  ;;  %v538_v11 = vadd.f32 %v537_v7, %v536_v1 }
  0xf2   :  { %v418_v12 = vsel %vm386_vm2, %v370_v62, %v402_v4  ;;  %v426_v13 = vsel %vm394_vm3, %v378_v63, %v410_v5  ;;  %v515_v14 = vpop.f32.mrf.mxu0  ;;  %v539_v15 = vpop.f32.mrf.mxu1 }
  0xf3   :  { %434 = vst [vmem:[%s822_s4 + $0x8] sm:$0xff] %v418_v12  ;;  %442 = vst [vmem:[%s822_s4 + $0x48] sm:$0xff] %v426_v13  ;;  %vm387_vm4 = vcmp.ge.f32.partialorder %v371_v8, 0.0  ;;  %v403_v16 = vmul.f32 0.2, %v371_v8  ;;  %vm395_vm5 = vcmp.ge.f32.partialorder %v379_v9, 0.0  ;;  %v349_v18 = vmul.f32 %v514_v10, %v731_v35 }
  0xf4   :  { %v411_v17 = vmul.f32 0.2, %v379_v9  ;;  %v357_v19 = vmul.f32 %v538_v11, %v731_v35  ;;  %v516_v20 = vpop.f32.mrf.mxu0  ;;  %v540_v21 = vpop.f32.mrf.mxu1 }
  0xf5   :  { %v419_v22 = vsel %vm387_vm4, %v371_v8, %v403_v16  ;;  %v517_v24 = vadd.f32 %v516_v20, %v515_v14  ;;  %v541_v25 = vadd.f32 %v540_v21, %v539_v15  ;;  %v372_v26 = vadd.f32 %v736_v39, %v349_v18 }
  0xf6   :  { %v427_v23 = vsel %vm395_vm5, %v379_v9, %v411_v17  ;;  %435 = vst [vmem:[%s822_s4 + $0x10] sm:$0xff] %v419_v22  ;;  %v380_v27 = vadd.f32 %v736_v39, %v357_v19  ;;  %v518_v28 = vpop.f32.mrf.mxu0  ;;  %v542_v29 = vpop.f32.mrf.mxu1 }
  0xf7   :  { %443 = vst [vmem:[%s822_s4 + $0x50] sm:$0xff] %v427_v23  ;;  %v350_v30 = vmul.f32 %v517_v24, %v731_v35  ;;  %v358_v31 = vmul.f32 %v541_v25, %v731_v35  ;;  %vm388_vm6 = vcmp.ge.f32.partialorder %v372_v26, 0.0  ;;  %v404_v32 = vmul.f32 0.2, %v372_v26 }
  0xf8   :  { %vm396_vm7 = vcmp.ge.f32.partialorder %v380_v27, 0.0  ;;  %v412_v33 = vmul.f32 0.2, %v380_v27  ;;  %v519_v34 = vpop.f32.mrf.mxu0  ;;  %v543_v36 = vpop.f32.mrf.mxu1 }
  0xf9   :  { %v373_v37 = vadd.f32 %v736_v39, %v350_v30  ;;  %v381_v38 = vadd.f32 %v736_v39, %v358_v31  ;;  %v520_v40 = vadd.f32 %v519_v34, %v518_v28  ;;  %v544_v41 = vadd.f32 %v543_v36, %v542_v29 }
  0xfa   :  { %v420_v42 = vsel %vm388_vm6, %v372_v26, %v404_v32  ;;  %v428_v43 = vsel %vm396_vm7, %v380_v27, %v412_v33  ;;  %v521_v44 = vpop.f32.mrf.mxu0  ;;  %v545_v45 = vpop.f32.mrf.mxu1 }
  0xfb   :  { %436 = vst [vmem:[%s822_s4 + $0x18] sm:$0xff] %v420_v42  ;;  %444 = vst [vmem:[%s822_s4 + $0x58] sm:$0xff] %v428_v43  ;;  %vm389_vm8 = vcmp.ge.f32.partialorder %v373_v37, 0.0  ;;  %v405_v46 = vmul.f32 0.2, %v373_v37  ;;  %vm397_vm9 = vcmp.ge.f32.partialorder %v381_v38, 0.0  ;;  %v351_v48 = vmul.f32 %v520_v40, %v731_v35 }
  0xfc   :  { %v413_v47 = vmul.f32 0.2, %v381_v38  ;;  %v359_v49 = vmul.f32 %v544_v41, %v731_v35  ;;  %v522_v50 = vpop.f32.mrf.mxu0  ;;  %v546_v51 = vpop.f32.mrf.mxu1 }
  0xfd   :  { %v421_v52 = vsel %vm389_vm8, %v373_v37, %v405_v46  ;;  %v523_v54 = vadd.f32 %v522_v50, %v521_v44  ;;  %v547_v55 = vadd.f32 %v546_v51, %v545_v45  ;;  %v374_v56 = vadd.f32 %v736_v39, %v351_v48 }
  0xfe   :  { %v429_v53 = vsel %vm397_vm9, %v381_v38, %v413_v47  ;;  %437 = vst [vmem:[%s822_s4 + $0x20] sm:$0xff] %v421_v52  ;;  %v382_v57 = vadd.f32 %v736_v39, %v359_v49  ;;  %v524_v58 = vpop.f32.mrf.mxu0  ;;  %v548_v59 = vpop.f32.mrf.mxu1 }
  0xff   :  { %445 = vst [vmem:[%s822_s4 + $0x60] sm:$0xff] %v429_v53  ;;  %v352_v60 = vmul.f32 %v523_v54, %v731_v35  ;;  %v360_v61 = vmul.f32 %v547_v55, %v731_v35  ;;  %vm390_vm10 = vcmp.ge.f32.partialorder %v374_v56, 0.0  ;;  %v406_v62 = vmul.f32 0.2, %v374_v56 }
 0x100   :  { %vm398_vm11 = vcmp.ge.f32.partialorder %v382_v57, 0.0  ;;  %v414_v63 = vmul.f32 0.2, %v382_v57  ;;  %v525_v0 = vpop.f32.mrf.mxu0  ;;  %v549_v1 = vpop.f32.mrf.mxu1 }
 0x101   :  { %v375_v2 = vadd.f32 %v736_v39, %v352_v60  ;;  %v383_v3 = vadd.f32 %v736_v39, %v360_v61  ;;  %v526_v4 = vadd.f32 %v525_v0, %v524_v58  ;;  %v550_v5 = vadd.f32 %v549_v1, %v548_v59 }
 0x102   :  { %v422_v6 = vsel %vm390_vm10, %v374_v56, %v406_v62  ;;  %v430_v7 = vsel %vm398_vm11, %v382_v57, %v414_v63 }
 0x103   :  { %438 = vst [vmem:[%s822_s4 + $0x28] sm:$0xff] %v422_v6  ;;  %446 = vst [vmem:[%s822_s4 + $0x68] sm:$0xff] %v430_v7  ;;  %vm391_vm12 = vcmp.ge.f32.partialorder %v375_v2, 0.0  ;;  %v407_v8 = vmul.f32 0.2, %v375_v2  ;;  %vm399_vm13 = vcmp.ge.f32.partialorder %v383_v3, 0.0  ;;  %v353_v10 = vmul.f32 %v526_v4, %v731_v35 }
 0x104   :  { %v415_v9 = vmul.f32 0.2, %v383_v3  ;;  %v361_v11 = vmul.f32 %v550_v5, %v731_v35 }
 0x105   :  { %v423_v12 = vsel %vm391_vm12, %v375_v2, %v407_v8  ;;  %v376_v14 = vadd.f32 %v736_v39, %v353_v10 }
 0x106   :  { %v431_v13 = vsel %vm399_vm13, %v383_v3, %v415_v9  ;;  %439 = vst [vmem:[%s822_s4 + $0x30] sm:$0xff] %v423_v12  ;;  %v384_v15 = vadd.f32 %v736_v39, %v361_v11 }
 0x107   :  { %447 = vst [vmem:[%s822_s4 + $0x70] sm:$0xff] %v431_v13  ;;  %vm392_vm14 = vcmp.ge.f32.partialorder %v376_v14, 0.0  ;;  %v408_v16 = vmul.f32 0.2, %v376_v14 }
 0x108   :  { %vm400_vm15 = vcmp.ge.f32.partialorder %v384_v15, 0.0  ;;  %v416_v17 = vmul.f32 0.2, %v384_v15 }
 0x109   :  { %v424_v18 = vsel %vm392_vm14, %v376_v14, %v408_v16 }
 0x10a   :  { %v432_v35 = vsel %vm400_vm15, %v384_v15, %v416_v17  ;;  %440 = vst [vmem:[%s822_s4 + $0x38] sm:$0xff] %v424_v18 }
 0x10b   :  { %448 = vst [vmem:[%s822_s4 + $0x78] sm:$0xff] %v432_v35 }

// kernel: forward.7
= control target key start
LH: loop header
LB: loop body
LE: loop exit
PB: predicated region body
PF: predicated region fallthrough
CT: control target
= control target key end

     0   :  { %s767_s1 = inlined_call_operand.vmem [shape: bf16[512,128], index: 1, kind: input, shape index: {}]   ;;  %s768_s0 = inlined_call_operand.vmem [shape: bf16[32,512], index: 0, kind: input, shape index: {}]   ;;  %s769_s2 = inlined_call_operand.vmem [shape: f32[1,128], index: 2, kind: input, shape index: {}]   ;;  %s770_s3 = inlined_call_operand.vmem [shape: f32[1,128], index: 3, kind: input, shape index: {}]   ;;  %s771_s4 = inlined_call_operand.vmem [shape: f32[32,128], index: 4, kind: output, shape index: {}]  }
   0x1   :  { %v560_v0 = vld [vmem:[%s767_s1 + $0x78] sm:$0xff]   ;;  %v564_v4 = vld [vmem:[%s767_s1 + $0x70] sm:$0xff]   ;;  %v568_v8 = vld [vmem:[%s767_s1 + $0x68] sm:$0xff]  }
   0x2   :  { %v561_v1 = vld [vmem:[%s767_s1 + $0xf8] sm:$0xff]   ;;  %504 = vmatprep.subr.bf16.mxu0 %v560_v0  ;;  %v565_v5 = vld [vmem:[%s767_s1 + $0xf0] sm:$0xff]   ;;  %v569_v9 = vld [vmem:[%s767_s1 + $0xe8] sm:$0xff]  }
   0x3   :  { %v562_v2 = vld [vmem:[%s767_s1 + $0x38] sm:$0xff]   ;;  %532 = vmatprep.subr.bf16.mxu1 %v561_v1  ;;  %v566_v6 = vld [vmem:[%s767_s1 + $0x30] sm:$0xff]   ;;  %v570_v10 = vld [vmem:[%s767_s1 + $0x28] sm:$0xff]  }
   0x4   :  { %v563_v3 = vld [vmem:[%s767_s1 + $0xb8] sm:$0xff]   ;;  %505 = vmatpush3.bf16.msra.mxu0 %v562_v2  ;;  %v567_v7 = vld [vmem:[%s767_s1 + $0xb0] sm:$0xff]   ;;  %v571_v11 = vld [vmem:[%s767_s1 + $0xa8] sm:$0xff]  }
   0x5   :  { %533 = vmatpush3.bf16.msra.mxu1 %v563_v3  ;;  %506 = vmatprep.subr.bf16.mxu0 %v564_v4  ;;  %v572_v12 = vld [vmem:[%s767_s1 + $0x60] sm:$0xff]   ;;  %v576_v16 = vld [vmem:[%s767_s1 + $0x58] sm:$0xff]   ;;  %v580_v20 = vld [vmem:[%s767_s1 + $0x50] sm:$0xff]  }
   0x6   :  { %534 = vmatprep.subr.bf16.mxu1 %v565_v5  ;;  %v573_v13 = vld [vmem:[%s767_s1 + $0xe0] sm:$0xff]   ;;  %v577_v17 = vld [vmem:[%s767_s1 + $0xd8] sm:$0xff]   ;;  %v581_v21 = vld [vmem:[%s767_s1 + $0xd0] sm:$0xff]  }
   0x7   :  { %v574_v14 = vld [vmem:[%s767_s1 + $0x20] sm:$0xff]   ;;  %v578_v18 = vld [vmem:[%s767_s1 + $0x18] sm:$0xff]   ;;  %v582_v22 = vld [vmem:[%s767_s1 + $0x10] sm:$0xff]  }
   0x8   :  { %507 = vmatpush3.bf16.msra.mxu0 %v566_v6  ;;  %v575_v15 = vld [vmem:[%s767_s1 + $0xa0] sm:$0xff]   ;;  %v579_v19 = vld [vmem:[%s767_s1 + $0x98] sm:$0xff]   ;;  %v583_v23 = vld [vmem:[%s767_s1 + $0x90] sm:$0xff]  }
   0x9   :  { %535 = vmatpush3.bf16.msra.mxu1 %v567_v7  ;;  %508 = vmatprep.subr.bf16.mxu0 %v568_v8  ;;  %v584_v24 = vld [vmem:[%s767_s1 + $0x48] sm:$0xff]   ;;  %v588_v28 = vld [vmem:[%s767_s1 + $0x40] sm:$0xff]  }
   0xa   :  { %536 = vmatprep.subr.bf16.mxu1 %v569_v9  ;;  %v585_v25 = vld [vmem:[%s767_s1 + $0xc8] sm:$0xff]   ;;  %v589_v29 = vld [vmem:[%s767_s1 + $0xc0] sm:$0xff]  }
   0xb   :  { %v586_v26 = vld [vmem:[%s767_s1 + $0x8] sm:$0xff]   ;;  %v590_v30 = vld [vmem:[%s767_s1] sm:$0xff]  }
   0xc   :  { %509 = vmatpush3.bf16.msra.mxu0 %v570_v10  ;;  %v587_v27 = vld [vmem:[%s767_s1 + $0x88] sm:$0xff]   ;;  %v591_v31 = vld [vmem:[%s767_s1 + $0x80] sm:$0xff]  }
   0xd   :  { %537 = vmatpush3.bf16.msra.mxu1 %v571_v11  ;;  %510 = vmatprep.subr.bf16.mxu0 %v572_v12  ;;  %v592_v32 = vld [vmem:[%s768_s0] ss:$16 sps:$4 sm:$0xff]   ;;  %v594_v33 = vld [vmem:[%s768_s0 + $0x4] ss:$16 sps:$4 sm:$0xff]   ;;  %v595_v34 = vld [vmem:[%s768_s0 + $0x8] ss:$16 sps:$4 sm:$0xff]  }
   0xe   :  { %538 = vmatprep.subr.bf16.mxu1 %v573_v13  ;;  %v597_v35 = vld [vmem:[%s768_s0 + $0xc] ss:$16 sps:$4 sm:$0xff]   ;;  %354 = vmatprep.mubr.bf16.mxu0 %v594_v33  ;;  %v598_v36 = vld [vmem:[%s768_s0 + $0x24] ss:$16 sps:$4 sm:$0xff]   ;;  %v602_v38 = vld [vmem:[%s768_s0 + $0x20] ss:$16 sps:$4 sm:$0xff]  }
   0xf   :  { %403 = vmatprep.mubr.bf16.mxu1 %v597_v35  ;;  %v600_v37 = vld [vmem:[%s768_s0 + $0x2c] ss:$16 sps:$4 sm:$0xff]   ;;  %v603_v39 = vld [vmem:[%s768_s0 + $0x28] ss:$16 sps:$4 sm:$0xff]   ;;  %v502_v47 = vld [vmem:[%s769_s2] ss:$0 sm:$0xff] }
  0x10   :  { %511 = vmatpush3.bf16.msra.mxu0 %v574_v14  ;;  %v503_v51 = vld [vmem:[%s770_s3] ss:$0 sm:$0xff] }
  0x11   :  { %539 = vmatpush3.bf16.msra.mxu1 %v575_v15  ;;  %512 = vmatprep.subr.bf16.mxu0 %v576_v16 }
  0x12   :  { %540 = vmatprep.subr.bf16.mxu1 %v577_v17 }
  0x14   :  { %513 = vmatpush3.bf16.msra.mxu0 %v578_v18 }
  0x15   :  { %541 = vmatpush3.bf16.msra.mxu1 %v579_v19  ;;  %514 = vmatprep.subr.bf16.mxu0 %v580_v20 }
  0x16   :  { %542 = vmatprep.subr.bf16.mxu1 %v581_v21 }
  0x18   :  { %515 = vmatpush3.bf16.msra.mxu0 %v582_v22 }
  0x19   :  { %543 = vmatpush3.bf16.msra.mxu1 %v583_v23  ;;  %516 = vmatprep.subr.bf16.mxu0 %v584_v24 }
  0x1a   :  { %544 = vmatprep.subr.bf16.mxu1 %v585_v25 }
  0x1c   :  { %517 = vmatpush3.bf16.msra.mxu0 %v586_v26 }
  0x1d   :  { %545 = vmatpush3.bf16.msra.mxu1 %v587_v27  ;;  %518 = vmatprep.subr.bf16.mxu0 %v588_v28 }
  0x1e   :  { %546 = vmatprep.subr.bf16.mxu1 %v589_v29 }
  0x20   :  { %519 = vmatpush3.bf16.msra.mxu0 %v590_v30 }
  0x21   :  { %547 = vmatpush3.bf16.msra.mxu1 %v591_v31 }
  0x23   :  { %355 = vmatmul.mubr.bf16.vlgmr.msra.gmra.mxu0 %v592_v32 }
  0x24   :  { %404 = vmatmul.mubr.bf16.vlgmr.msra.gmra.mxu1 %v595_v34  ;;  %362 = vmatprep.mubr.bf16.mxu0 %v598_v36 }
  0x25   :  { %411 = vmatprep.mubr.bf16.mxu1 %v600_v37 }
  0x2b   :  { %363 = vmatmul.mubr.bf16.gmra.mxu0 %v602_v38 }
  0x2c   :  { %412 = vmatmul.mubr.bf16.gmra.mxu1 %v603_v39 }
  0xe3   :  { %v520_v40 = vpop.f32.mrf.mxu0 }
  0xe4   :  { %v548_v41 = vpop.f32.mrf.mxu1 }
  0xe5   :  { %v521_v42 = vpop.f32.mrf.mxu0 }
  0xe6   :  { %v522_v43 = vadd.f32 %v521_v42, %v520_v40  ;;  %v549_v44 = vpop.f32.mrf.mxu1 }
  0xe7   :  { %v550_v45 = vadd.f32 %v549_v44, %v548_v41  ;;  %v523_v46 = vpop.f32.mrf.mxu0 }
  0xe8   :  { %v551_v48 = vpop.f32.mrf.mxu1 }
  0xe9   :  { %v406_v49 = vadd.f32 %v550_v45, %v522_v43  ;;  %v524_v50 = vpop.f32.mrf.mxu0 }
  0xea   :  { %v525_v52 = vadd.f32 %v524_v50, %v523_v46  ;;  %v552_v53 = vpop.f32.mrf.mxu1 }
  0xeb   :  { %v427_v54 = vmul.f32 %v502_v47, %v406_v49  ;;  %v553_v55 = vadd.f32 %v552_v53, %v551_v48  ;;  %v526_v56 = vpop.f32.mrf.mxu0 }
  0xec   :  { %v554_v57 = vpop.f32.mrf.mxu1 }
  0xed   :  { %v438_v58 = vadd.f32 %v503_v51, %v427_v54  ;;  %v409_v59 = vadd.f32 %v553_v55, %v525_v52  ;;  %v527_v60 = vpop.f32.mrf.mxu0 }
  0xee   :  { %v528_v61 = vadd.f32 %v527_v60, %v526_v56  ;;  %v555_v62 = vpop.f32.mrf.mxu1 }
  0xef   :  { %vm442_vm0 = vcmp.ge.f32.partialorder %v438_v58, 0.0  ;;  %v446_v63 = vmul.f32 0.2, %v438_v58  ;;  %v428_v0 = vmul.f32 %v502_v47, %v409_v59  ;;  %v556_v1 = vadd.f32 %v555_v62, %v554_v57  ;;  %v529_v2 = vpop.f32.mrf.mxu0 }
  0xf0   :  { %v557_v3 = vpop.f32.mrf.mxu1 }
  0xf1   :  { %v450_v4 = vsel %vm442_vm0, %v438_v58, %v446_v63  ;;  %v439_v5 = vadd.f32 %v503_v51, %v428_v0  ;;  %v414_v6 = vadd.f32 %v556_v1, %v528_v61  ;;  %v530_v7 = vpop.f32.mrf.mxu0 }
  0xf2   :  { %454 = vst [vmem:[%s771_s4] sm:$0xff] %v450_v4  ;;  %v531_v8 = vadd.f32 %v530_v7, %v529_v2  ;;  %v558_v9 = vpop.f32.mrf.mxu1 }
  0xf3   :  { %vm443_vm1 = vcmp.ge.f32.partialorder %v439_v5, 0.0  ;;  %v447_v10 = vmul.f32 0.2, %v439_v5  ;;  %v429_v11 = vmul.f32 %v502_v47, %v414_v6  ;;  %v559_v12 = vadd.f32 %v558_v9, %v557_v3 }
  0xf5   :  { %v451_v13 = vsel %vm443_vm1, %v439_v5, %v447_v10  ;;  %v440_v14 = vadd.f32 %v503_v51, %v429_v11  ;;  %v417_v15 = vadd.f32 %v559_v12, %v531_v8 }
  0xf6   :  { %455 = vst [vmem:[%s771_s4 + $0x8] sm:$0xff] %v451_v13 }
  0xf7   :  { %vm444_vm2 = vcmp.ge.f32.partialorder %v440_v14, 0.0  ;;  %v448_v16 = vmul.f32 0.2, %v440_v14  ;;  %v430_v17 = vmul.f32 %v502_v47, %v417_v15 }
  0xf9   :  { %v452_v18 = vsel %vm444_vm2, %v440_v14, %v448_v16  ;;  %v441_v19 = vadd.f32 %v503_v51, %v430_v17 }
  0xfa   :  { %456 = vst [vmem:[%s771_s4 + $0x10] sm:$0xff] %v452_v18 }
  0xfb   :  { %vm445_vm3 = vcmp.ge.f32.partialorder %v441_v19, 0.0  ;;  %v449_v20 = vmul.f32 0.2, %v441_v19 }
  0xfd   :  { %v453_v21 = vsel %vm445_vm3, %v441_v19, %v449_v20 }
  0xfe   :  { %457 = vst [vmem:[%s771_s4 + $0x18] sm:$0xff] %v453_v21 }

// kernel: forward.8
= control target key start
LH: loop header
LB: loop body
LE: loop exit
PB: predicated region body
PF: predicated region fallthrough
CT: control target
= control target key end

     0   :  { %s1405_s1 = inlined_call_operand.vmem [shape: bf16[1024,128], index: 1, kind: input, shape index: {}]   ;;  %s1406_s0 = inlined_call_operand.vmem [shape: bf16[32,1024], index: 0, kind: input, shape index: {}]   ;;  %s1407_s2 = inlined_call_operand.vmem [shape: f32[1,128], index: 2, kind: input, shape index: {}]   ;;  %s1408_s3 = inlined_call_operand.vmem [shape: f32[1,128], index: 3, kind: input, shape index: {}]   ;;  %s1409_s4 = inlined_call_operand.vmem [shape: f32[32,128], index: 4, kind: output, shape index: {}]  }
   0x1   :  { %v1058_v0 = vld [vmem:[%s1405_s1 + $0x78] sm:$0xff]   ;;  %v1062_v4 = vld [vmem:[%s1405_s1 + $0x70] sm:$0xff]   ;;  %v1066_v8 = vld [vmem:[%s1405_s1 + $0x68] sm:$0xff]  }
   0x2   :  { %v1059_v1 = vld [vmem:[%s1405_s1 + $0xf8] sm:$0xff]   ;;  %946 = vmatprep.subr.bf16.mxu0 %v1058_v0  ;;  %v1063_v5 = vld [vmem:[%s1405_s1 + $0xf0] sm:$0xff]   ;;  %v1067_v9 = vld [vmem:[%s1405_s1 + $0xe8] sm:$0xff]  }
   0x3   :  { %v1060_v2 = vld [vmem:[%s1405_s1 + $0x38] sm:$0xff]   ;;  %974 = vmatprep.subr.bf16.mxu1 %v1059_v1  ;;  %v1064_v6 = vld [vmem:[%s1405_s1 + $0x30] sm:$0xff]   ;;  %v1068_v10 = vld [vmem:[%s1405_s1 + $0x28] sm:$0xff]  }
   0x4   :  { %v1061_v3 = vld [vmem:[%s1405_s1 + $0xb8] sm:$0xff]   ;;  %947 = vmatpush3.bf16.msra.mxu0 %v1060_v2  ;;  %v1065_v7 = vld [vmem:[%s1405_s1 + $0xb0] sm:$0xff]   ;;  %v1069_v11 = vld [vmem:[%s1405_s1 + $0xa8] sm:$0xff]  }
   0x5   :  { %975 = vmatpush3.bf16.msra.mxu1 %v1061_v3  ;;  %948 = vmatprep.subr.bf16.mxu0 %v1062_v4  ;;  %v1070_v12 = vld [vmem:[%s1405_s1 + $0x60] sm:$0xff]   ;;  %v1074_v16 = vld [vmem:[%s1405_s1 + $0x58] sm:$0xff]   ;;  %v1078_v20 = vld [vmem:[%s1405_s1 + $0x50] sm:$0xff]  }
   0x6   :  { %976 = vmatprep.subr.bf16.mxu1 %v1063_v5  ;;  %v1071_v13 = vld [vmem:[%s1405_s1 + $0xe0] sm:$0xff]   ;;  %v1075_v17 = vld [vmem:[%s1405_s1 + $0xd8] sm:$0xff]   ;;  %v1079_v21 = vld [vmem:[%s1405_s1 + $0xd0] sm:$0xff]  }
   0x7   :  { %v1072_v14 = vld [vmem:[%s1405_s1 + $0x20] sm:$0xff]   ;;  %v1076_v18 = vld [vmem:[%s1405_s1 + $0x18] sm:$0xff]   ;;  %v1080_v22 = vld [vmem:[%s1405_s1 + $0x10] sm:$0xff]  }
   0x8   :  { %949 = vmatpush3.bf16.msra.mxu0 %v1064_v6  ;;  %v1073_v15 = vld [vmem:[%s1405_s1 + $0xa0] sm:$0xff]   ;;  %v1077_v19 = vld [vmem:[%s1405_s1 + $0x98] sm:$0xff]   ;;  %v1081_v23 = vld [vmem:[%s1405_s1 + $0x90] sm:$0xff]  }
   0x9   :  { %977 = vmatpush3.bf16.msra.mxu1 %v1065_v7  ;;  %950 = vmatprep.subr.bf16.mxu0 %v1066_v8  ;;  %v1082_v24 = vld [vmem:[%s1405_s1 + $0x48] sm:$0xff]   ;;  %v1086_v28 = vld [vmem:[%s1405_s1 + $0x40] sm:$0xff]   ;;  %v1090_v40 = vld [vmem:[%s1405_s1 + $0x178] sm:$0xff]  }
   0xa   :  { %978 = vmatprep.subr.bf16.mxu1 %v1067_v9  ;;  %v1083_v25 = vld [vmem:[%s1405_s1 + $0xc8] sm:$0xff]   ;;  %v1087_v29 = vld [vmem:[%s1405_s1 + $0xc0] sm:$0xff]   ;;  %v1091_v41 = vld [vmem:[%s1405_s1 + $0x1f8] sm:$0xff]  }
   0xb   :  { %v1084_v26 = vld [vmem:[%s1405_s1 + $0x8] sm:$0xff]   ;;  %v1088_v30 = vld [vmem:[%s1405_s1] sm:$0xff]   ;;  %v1092_v42 = vld [vmem:[%s1405_s1 + $0x138] sm:$0xff]  }
   0xc   :  { %951 = vmatpush3.bf16.msra.mxu0 %v1068_v10  ;;  %v1085_v27 = vld [vmem:[%s1405_s1 + $0x88] sm:$0xff]   ;;  %v1089_v31 = vld [vmem:[%s1405_s1 + $0x80] sm:$0xff]   ;;  %v1093_v43 = vld [vmem:[%s1405_s1 + $0x1b8] sm:$0xff]  }
   0xd   :  { %979 = vmatpush3.bf16.msra.mxu1 %v1069_v11  ;;  %952 = vmatprep.subr.bf16.mxu0 %v1070_v12  ;;  %v18_v32 = vld [vmem:[%s1406_s0] sm:$0xff]  ;;  %v19_v34 = vld [vmem:[%s1406_s0 + $0x8] sm:$0xff]  ;;  %v1094_v44 = vld [vmem:[%s1405_s1 + $0x170] sm:$0xff]  }
   0xe   :  { %980 = vmatprep.subr.bf16.mxu1 %v1071_v13  ;;  %v22_v33 = vld [vmem:[%s1406_s0 + $0x20] sm:$0xff]  ;;  %v23_v37 = vld [vmem:[%s1406_s0 + $0x28] sm:$0xff]  ;;  %v1095_v45 = vld [vmem:[%s1405_s1 + $0x1f0] sm:$0xff]  }
   0xf   :  { %v864_v35 = vcombine.low %v18_v32, %v22_v33  ;;  %v865_v36 = vcombine.high %v18_v32, %v22_v33  ;;  %v866_v38 = vcombine.low %v19_v34, %v23_v37  ;;  %v867_v39 = vcombine.high %v19_v34, %v23_v37  ;;  %v1096_v46 = vld [vmem:[%s1405_s1 + $0x130] sm:$0xff]   ;;  %v1098_v48 = vld [vmem:[%s1405_s1 + $0x168] sm:$0xff]   ;;  %v1102_v52 = vld [vmem:[%s1405_s1 + $0x160] sm:$0xff]  }
  0x10   :  { %953 = vmatpush3.bf16.msra.mxu0 %v1072_v14  ;;  %v1097_v47 = vld [vmem:[%s1405_s1 + $0x1b0] sm:$0xff]   ;;  %v1099_v49 = vld [vmem:[%s1405_s1 + $0x1e8] sm:$0xff]   ;;  %v1103_v53 = vld [vmem:[%s1405_s1 + $0x1e0] sm:$0xff]  }
  0x11   :  { %981 = vmatpush3.bf16.msra.mxu1 %v1073_v15  ;;  %954 = vmatprep.subr.bf16.mxu0 %v1074_v16  ;;  %v1100_v50 = vld [vmem:[%s1405_s1 + $0x128] sm:$0xff]   ;;  %v1104_v54 = vld [vmem:[%s1405_s1 + $0x120] sm:$0xff]   ;;  %v1106_v56 = vld [vmem:[%s1405_s1 + $0x158] sm:$0xff]  }
  0x12   :  { %982 = vmatprep.subr.bf16.mxu1 %v1075_v17  ;;  %658 = vmatprep.mubr.bf16.mxu0 %v865_v36  ;;  %v1101_v51 = vld [vmem:[%s1405_s1 + $0x1a8] sm:$0xff]   ;;  %v1105_v55 = vld [vmem:[%s1405_s1 + $0x1a0] sm:$0xff]   ;;  %v1107_v57 = vld [vmem:[%s1405_s1 + $0x1d8] sm:$0xff]  }
  0x13   :  { %707 = vmatprep.mubr.bf16.mxu1 %v867_v39  ;;  %v26_v58 = vld [vmem:[%s1406_s0 + $0x40] sm:$0xff]  ;;  %v27_v61 = vld [vmem:[%s1406_s0 + $0x48] sm:$0xff]  ;;  %v1108_v1 = vld [vmem:[%s1405_s1 + $0x118] sm:$0xff]  }
  0x14   :  { %955 = vmatpush3.bf16.msra.mxu0 %v1076_v18  ;;  %v30_v59 = vld [vmem:[%s1406_s0 + $0x60] sm:$0xff]  ;;  %v31_v62 = vld [vmem:[%s1406_s0 + $0x68] sm:$0xff]  ;;  %v1109_v3 = vld [vmem:[%s1405_s1 + $0x198] sm:$0xff]  }
  0x15   :  { %983 = vmatpush3.bf16.msra.mxu1 %v1077_v19  ;;  %956 = vmatprep.subr.bf16.mxu0 %v1078_v20  ;;  %v873_v60 = vcombine.high %v26_v58, %v30_v59  ;;  %v872_v63 = vcombine.low %v26_v58, %v30_v59  ;;  %v875_v0 = vcombine.high %v27_v61, %v31_v62  ;;  %v1110_v4 = vld [vmem:[%s1405_s1 + $0x150] sm:$0xff]   ;;  %v1114_v8 = vld [vmem:[%s1405_s1 + $0x148] sm:$0xff]   ;;  %v1118_v12 = vld [vmem:[%s1405_s1 + $0x140] sm:$0xff]  }
  0x16   :  { %984 = vmatprep.subr.bf16.mxu1 %v1079_v21  ;;  %v874_v2 = vcombine.low %v27_v61, %v31_v62  ;;  %v1111_v5 = vld [vmem:[%s1405_s1 + $0x1d0] sm:$0xff]   ;;  %v1115_v9 = vld [vmem:[%s1405_s1 + $0x1c8] sm:$0xff]   ;;  %v1119_v13 = vld [vmem:[%s1405_s1 + $0x1c0] sm:$0xff]  }
  0x17   :  { %v1112_v6 = vld [vmem:[%s1405_s1 + $0x110] sm:$0xff]   ;;  %v1116_v10 = vld [vmem:[%s1405_s1 + $0x108] sm:$0xff]   ;;  %v1120_v14 = vld [vmem:[%s1405_s1 + $0x100] sm:$0xff]  }
  0x18   :  { %957 = vmatpush3.bf16.msra.mxu0 %v1080_v22  ;;  %v1113_v7 = vld [vmem:[%s1405_s1 + $0x190] sm:$0xff]   ;;  %v1117_v11 = vld [vmem:[%s1405_s1 + $0x188] sm:$0xff]   ;;  %v1121_v15 = vld [vmem:[%s1405_s1 + $0x180] sm:$0xff]  }
  0x19   :  { %985 = vmatpush3.bf16.msra.mxu1 %v1081_v23  ;;  %958 = vmatprep.subr.bf16.mxu0 %v1082_v24  ;;  %v20_v16 = vld [vmem:[%s1406_s0 + $0x10] sm:$0xff]  ;;  %v21_v18 = vld [vmem:[%s1406_s0 + $0x18] sm:$0xff] }
  0x1a   :  { %986 = vmatprep.subr.bf16.mxu1 %v1083_v25  ;;  %v24_v17 = vld [vmem:[%s1406_s0 + $0x30] sm:$0xff]  ;;  %v25_v19 = vld [vmem:[%s1406_s0 + $0x38] sm:$0xff] }
  0x1b   :  { %v868_v20 = vcombine.low %v20_v16, %v24_v17  ;;  %v869_v21 = vcombine.high %v20_v16, %v24_v17  ;;  %v870_v22 = vcombine.low %v21_v18, %v25_v19  ;;  %v871_v23 = vcombine.high %v21_v18, %v25_v19  ;;  %v28_v24 = vld [vmem:[%s1406_s0 + $0x50] sm:$0xff] }
  0x1c   :  { %959 = vmatpush3.bf16.msra.mxu0 %v1084_v26  ;;  %v32_v25 = vld [vmem:[%s1406_s0 + $0x70] sm:$0xff]  ;;  %v29_v26 = vld [vmem:[%s1406_s0 + $0x58] sm:$0xff] }
  0x1d   :  { %987 = vmatpush3.bf16.msra.mxu1 %v1085_v27  ;;  %960 = vmatprep.subr.bf16.mxu0 %v1086_v28  ;;  %v877_v27 = vcombine.high %v28_v24, %v32_v25  ;;  %v33_v28 = vld [vmem:[%s1406_s0 + $0x78] sm:$0xff] }
  0x1e   :  { %988 = vmatprep.subr.bf16.mxu1 %v1087_v29  ;;  %v879_v29 = vcombine.high %v29_v26, %v33_v28 }
  0x20   :  { %961 = vmatpush3.bf16.msra.mxu0 %v1088_v30  ;;  %v876_v30 = vcombine.low %v28_v24, %v32_v25 }
  0x21   :  { %989 = vmatpush3.bf16.msra.mxu1 %v1089_v31  ;;  %1002 = vmatprep.subr.bf16.mxu0 %v1090_v40  ;;  %v878_v31 = vcombine.low %v29_v26, %v33_v28 }
  0x22   :  { %1030 = vmatprep.subr.bf16.mxu1 %v1091_v41 }
  0x23   :  { %659 = vmatmul.mubr.bf16.vlgmr.msra.gmra.mxu0 %v864_v35 }
  0x24   :  { %708 = vmatmul.mubr.bf16.vlgmr.msra.gmra.mxu1 %v866_v38  ;;  %1003 = vmatpush3.bf16.msra.mxu0 %v1092_v42 }
  0x25   :  { %1031 = vmatpush3.bf16.msra.mxu1 %v1093_v43  ;;  %1004 = vmatprep.subr.bf16.mxu0 %v1094_v44 }
  0x26   :  { %1032 = vmatprep.subr.bf16.mxu1 %v1095_v45  ;;  %666 = vmatprep.mubr.bf16.mxu0 %v873_v60 }
  0x27   :  { %715 = vmatprep.mubr.bf16.mxu1 %v875_v0 }
  0x28   :  { %1005 = vmatpush3.bf16.msra.mxu0 %v1096_v46 }
  0x29   :  { %1033 = vmatpush3.bf16.msra.mxu1 %v1097_v47  ;;  %1006 = vmatprep.subr.bf16.mxu0 %v1098_v48 }
  0x2a   :  { %1034 = vmatprep.subr.bf16.mxu1 %v1099_v49 }
  0x2b   :  { %667 = vmatmul.mubr.bf16.gmra.mxu0 %v872_v63  ;;  %v944_v63 = vld [vmem:[%s1407_s2] ss:$0 sm:$0xff] }
  0x2c   :  { %1007 = vmatpush3.bf16.msra.mxu0 %v1100_v50  ;;  %716 = vmatmul.mubr.bf16.gmra.mxu1 %v874_v2 }
  0x2d   :  { %1035 = vmatpush3.bf16.msra.mxu1 %v1101_v51  ;;  %1008 = vmatprep.subr.bf16.mxu0 %v1102_v52 }
  0x2e   :  { %1036 = vmatprep.subr.bf16.mxu1 %v1103_v53  ;;  %756 = vmatprep.mubr.bf16.mxu0 %v869_v21 }
  0x2f   :  { %805 = vmatprep.mubr.bf16.mxu1 %v871_v23 }
  0x30   :  { %1009 = vmatpush3.bf16.msra.mxu0 %v1104_v54 }
  0x31   :  { %1037 = vmatpush3.bf16.msra.mxu1 %v1105_v55  ;;  %1010 = vmatprep.subr.bf16.mxu0 %v1106_v56 }
  0x32   :  { %1038 = vmatprep.subr.bf16.mxu1 %v1107_v57 }
  0x34   :  { %1011 = vmatpush3.bf16.msra.mxu0 %v1108_v1 }
  0x35   :  { %1039 = vmatpush3.bf16.msra.mxu1 %v1109_v3  ;;  %1012 = vmatprep.subr.bf16.mxu0 %v1110_v4 }
  0x36   :  { %1040 = vmatprep.subr.bf16.mxu1 %v1111_v5 }
  0x38   :  { %1013 = vmatpush3.bf16.msra.mxu0 %v1112_v6  ;;  %v945_v6 = vld [vmem:[%s1408_s3] ss:$0 sm:$0xff] }
  0x39   :  { %1041 = vmatpush3.bf16.msra.mxu1 %v1113_v7  ;;  %1014 = vmatprep.subr.bf16.mxu0 %v1114_v8 }
  0x3a   :  { %1042 = vmatprep.subr.bf16.mxu1 %v1115_v9 }
  0x3c   :  { %1015 = vmatpush3.bf16.msra.mxu0 %v1116_v10 }
  0x3d   :  { %1043 = vmatpush3.bf16.msra.mxu1 %v1117_v11  ;;  %1016 = vmatprep.subr.bf16.mxu0 %v1118_v12 }
  0x3e   :  { %1044 = vmatprep.subr.bf16.mxu1 %v1119_v13 }
  0x40   :  { %1017 = vmatpush3.bf16.msra.mxu0 %v1120_v14 }
  0x41   :  { %1045 = vmatpush3.bf16.msra.mxu1 %v1121_v15 }
  0x43   :  { %757 = vmatmul.mubr.bf16.vlgmr.msra.gmra.mxu0 %v868_v20 }
  0x44   :  { %806 = vmatmul.mubr.bf16.vlgmr.msra.gmra.mxu1 %v870_v22  ;;  %764 = vmatprep.mubr.bf16.mxu0 %v877_v27 }
  0x45   :  { %813 = vmatprep.mubr.bf16.mxu1 %v879_v29 }
  0x4b   :  { %765 = vmatmul.mubr.bf16.gmra.mxu0 %v876_v30 }
  0x4c   :  { %814 = vmatmul.mubr.bf16.gmra.mxu1 %v878_v31 }
  0xe3   :  { %v962_v32 = vpop.f32.mrf.mxu0 }
  0xe4   :  { %v990_v33 = vpop.f32.mrf.mxu1 }
  0xe5   :  { %v963_v34 = vpop.f32.mrf.mxu0 }
  0xe6   :  { %v991_v35 = vpop.f32.mrf.mxu1  ;;  %v964_v48 = vadd.f32 %v963_v34, %v962_v32 }
  0xe7   :  { %v965_v36 = vpop.f32.mrf.mxu0  ;;  %v992_v49 = vadd.f32 %v991_v35, %v990_v33 }
  0xe8   :  { %v993_v37 = vpop.f32.mrf.mxu1 }
  0xe9   :  { %v966_v38 = vpop.f32.mrf.mxu0  ;;  %v710_v56 = vadd.f32 %v992_v49, %v964_v48 }
  0xea   :  { %v994_v39 = vpop.f32.mrf.mxu1  ;;  %v967_v52 = vadd.f32 %v966_v38, %v965_v36 }
  0xeb   :  { %v968_v40 = vpop.f32.mrf.mxu0  ;;  %v995_v53 = vadd.f32 %v994_v39, %v993_v37 }
  0xec   :  { %v996_v41 = vpop.f32.mrf.mxu1 }
  0xed   :  { %v969_v42 = vpop.f32.mrf.mxu0  ;;  %v713_v62 = vadd.f32 %v995_v53, %v967_v52 }
  0xee   :  { %v997_v43 = vpop.f32.mrf.mxu1  ;;  %v970_v2 = vadd.f32 %v969_v42, %v968_v40 }
  0xef   :  { %v971_v44 = vpop.f32.mrf.mxu0  ;;  %v998_v3 = vadd.f32 %v997_v43, %v996_v41 }
  0xf0   :  { %v999_v45 = vpop.f32.mrf.mxu1 }
  0xf1   :  { %v972_v46 = vpop.f32.mrf.mxu0  ;;  %v718_v16 = vadd.f32 %v998_v3, %v970_v2 }
  0xf2   :  { %v1000_v47 = vpop.f32.mrf.mxu1  ;;  %v973_v12 = vadd.f32 %v972_v46, %v971_v44 }
  0xf3   :  { %v1001_v13 = vadd.f32 %v1000_v47, %v999_v45 }
  0xf5   :  { %v721_v26 = vadd.f32 %v1001_v13, %v973_v12 }
 0x103   :  { %v1018_v50 = vpop.f32.mrf.mxu0 }
 0x104   :  { %v1046_v51 = vpop.f32.mrf.mxu1 }
 0x105   :  { %v1019_v54 = vpop.f32.mrf.mxu0 }
 0x106   :  { %v1047_v55 = vpop.f32.mrf.mxu1  ;;  %v1020_v57 = vadd.f32 %v1019_v54, %v1018_v50 }
 0x107   :  { %v1021_v58 = vpop.f32.mrf.mxu0  ;;  %v1048_v61 = vadd.f32 %v1047_v55, %v1046_v51 }
 0x108   :  { %v1049_v59 = vpop.f32.mrf.mxu1  ;;  %v759_v60 = vadd.f32 %v1020_v57, %v710_v56 }
 0x109   :  { %v1022_v0 = vpop.f32.mrf.mxu0 }
 0x10a   :  { %v1050_v1 = vpop.f32.mrf.mxu1  ;;  %v808_v4 = vadd.f32 %v1048_v61, %v759_v60  ;;  %v1023_v5 = vadd.f32 %v1022_v0, %v1021_v58 }
 0x10b   :  { %v1024_v7 = vpop.f32.mrf.mxu0  ;;  %v1051_v11 = vadd.f32 %v1050_v1, %v1049_v59 }
 0x10c   :  { %v1052_v8 = vpop.f32.mrf.mxu1  ;;  %v829_v9 = vmul.f32 %v944_v63, %v808_v4  ;;  %v762_v10 = vadd.f32 %v1023_v5, %v713_v62 }
 0x10d   :  { %v1025_v14 = vpop.f32.mrf.mxu0 }
 0x10e   :  { %v1053_v15 = vpop.f32.mrf.mxu1  ;;  %v840_v17 = vadd.f32 %v945_v6, %v829_v9  ;;  %v811_v18 = vadd.f32 %v1051_v11, %v762_v10  ;;  %v1026_v19 = vadd.f32 %v1025_v14, %v1024_v7 }
 0x10f   :  { %v1054_v20 = vadd.f32 %v1053_v15, %v1052_v8  ;;  %v1027_v21 = vpop.f32.mrf.mxu0 }
 0x110   :  { %v1055_v22 = vpop.f32.mrf.mxu1  ;;  %vm844_vm0 = vcmp.ge.f32.partialorder %v840_v17, 0.0  ;;  %v848_v23 = vmul.f32 0.2, %v840_v17  ;;  %v830_v24 = vmul.f32 %v944_v63, %v811_v18  ;;  %v767_v25 = vadd.f32 %v1026_v19, %v718_v16 }
 0x111   :  { %v1028_v27 = vpop.f32.mrf.mxu0 }
 0x112   :  { %v1056_v28 = vpop.f32.mrf.mxu1  ;;  %v852_v29 = vsel %vm844_vm0, %v840_v17, %v848_v23  ;;  %v841_v30 = vadd.f32 %v945_v6, %v830_v24  ;;  %v816_v31 = vadd.f32 %v1054_v20, %v767_v25  ;;  %v1029_v32 = vadd.f32 %v1028_v27, %v1027_v21 }
 0x113   :  { %856 = vst [vmem:[%s1409_s4] sm:$0xff] %v852_v29  ;;  %v1057_v33 = vadd.f32 %v1056_v28, %v1055_v22 }
 0x114   :  { %vm845_vm1 = vcmp.ge.f32.partialorder %v841_v30, 0.0  ;;  %v849_v34 = vmul.f32 0.2, %v841_v30  ;;  %v831_v35 = vmul.f32 %v944_v63, %v816_v31  ;;  %v770_v36 = vadd.f32 %v1029_v32, %v721_v26 }
 0x116   :  { %v853_v37 = vsel %vm845_vm1, %v841_v30, %v849_v34  ;;  %v842_v38 = vadd.f32 %v945_v6, %v831_v35  ;;  %v819_v39 = vadd.f32 %v1057_v33, %v770_v36 }
 0x117   :  { %857 = vst [vmem:[%s1409_s4 + $0x8] sm:$0xff] %v853_v37 }
 0x118   :  { %vm846_vm2 = vcmp.ge.f32.partialorder %v842_v38, 0.0  ;;  %v850_v40 = vmul.f32 0.2, %v842_v38  ;;  %v832_v41 = vmul.f32 %v944_v63, %v819_v39 }
 0x11a   :  { %v854_v42 = vsel %vm846_vm2, %v842_v38, %v850_v40  ;;  %v843_v43 = vadd.f32 %v945_v6, %v832_v41 }
 0x11b   :  { %858 = vst [vmem:[%s1409_s4 + $0x10] sm:$0xff] %v854_v42 }
 0x11c   :  { %vm847_vm3 = vcmp.ge.f32.partialorder %v843_v43, 0.0  ;;  %v851_v44 = vmul.f32 0.2, %v843_v43 }
 0x11e   :  { %v855_v45 = vsel %vm847_vm3, %v843_v43, %v851_v44 }
 0x11f   :  { %859 = vst [vmem:[%s1409_s4 + $0x18] sm:$0xff] %v855_v45 }

// kernel: forward.9
= control target key start
LH: loop header
LB: loop body
LE: loop exit
PB: predicated region body
PF: predicated region fallthrough
CT: control target
= control target key end

     0   :  { %s2409_s1 = inlined_call_operand.vmem [shape: bf16[2048,128], index: 1, kind: input, shape index: {}]   ;;  %s2410_s0 = inlined_call_operand.vmem [shape: bf16[16,2048], index: 0, kind: input, shape index: {}]   ;;  %s2411_s2 = inlined_call_operand.vmem [shape: f32[1,128], index: 2, kind: input, shape index: {}]   ;;  %s2412_s3 = inlined_call_operand.vmem [shape: f32[1,128], index: 3, kind: input, shape index: {}]   ;;  %s2413_s4 = inlined_call_operand.vmem [shape: f32[16,128], index: 4, kind: output, shape index: {}]  }
   0x1   :  { %v1812_v0 = vld [vmem:[%s2409_s1 + $0x78] sm:$0xff]   ;;  %v1816_v4 = vld [vmem:[%s2409_s1 + $0x70] sm:$0xff]   ;;  %v1820_v8 = vld [vmem:[%s2409_s1 + $0x68] sm:$0xff]  }
   0x2   :  { %v1813_v1 = vld [vmem:[%s2409_s1 + $0xf8] sm:$0xff]   ;;  %1636 = vmatprep.subr.bf16.mxu0 %v1812_v0  ;;  %v1817_v5 = vld [vmem:[%s2409_s1 + $0xf0] sm:$0xff]   ;;  %v1821_v9 = vld [vmem:[%s2409_s1 + $0xe8] sm:$0xff]  }
   0x3   :  { %v1814_v2 = vld [vmem:[%s2409_s1 + $0x38] sm:$0xff]   ;;  %1658 = vmatprep.subr.bf16.mxu1 %v1813_v1  ;;  %v1818_v6 = vld [vmem:[%s2409_s1 + $0x30] sm:$0xff]   ;;  %v1822_v10 = vld [vmem:[%s2409_s1 + $0x28] sm:$0xff]  }
   0x4   :  { %v1815_v3 = vld [vmem:[%s2409_s1 + $0xb8] sm:$0xff]   ;;  %1637 = vmatpush3.bf16.msra.mxu0 %v1814_v2  ;;  %v1819_v7 = vld [vmem:[%s2409_s1 + $0xb0] sm:$0xff]   ;;  %v1823_v11 = vld [vmem:[%s2409_s1 + $0xa8] sm:$0xff]  }
   0x5   :  { %1659 = vmatpush3.bf16.msra.mxu1 %v1815_v3  ;;  %1638 = vmatprep.subr.bf16.mxu0 %v1816_v4  ;;  %v1824_v12 = vld [vmem:[%s2409_s1 + $0x60] sm:$0xff]   ;;  %v1828_v16 = vld [vmem:[%s2409_s1 + $0x58] sm:$0xff]   ;;  %v1832_v20 = vld [vmem:[%s2409_s1 + $0x50] sm:$0xff]  }
   0x6   :  { %1660 = vmatprep.subr.bf16.mxu1 %v1817_v5  ;;  %v1825_v13 = vld [vmem:[%s2409_s1 + $0xe0] sm:$0xff]   ;;  %v1829_v17 = vld [vmem:[%s2409_s1 + $0xd8] sm:$0xff]   ;;  %v1833_v21 = vld [vmem:[%s2409_s1 + $0xd0] sm:$0xff]  }
   0x7   :  { %v1826_v14 = vld [vmem:[%s2409_s1 + $0x20] sm:$0xff]   ;;  %v1830_v18 = vld [vmem:[%s2409_s1 + $0x18] sm:$0xff]   ;;  %v1834_v22 = vld [vmem:[%s2409_s1 + $0x10] sm:$0xff]  }
   0x8   :  { %1639 = vmatpush3.bf16.msra.mxu0 %v1818_v6  ;;  %v1827_v15 = vld [vmem:[%s2409_s1 + $0xa0] sm:$0xff]   ;;  %v1831_v19 = vld [vmem:[%s2409_s1 + $0x98] sm:$0xff]   ;;  %v1835_v23 = vld [vmem:[%s2409_s1 + $0x90] sm:$0xff]  }
   0x9   :  { %1661 = vmatpush3.bf16.msra.mxu1 %v1819_v7  ;;  %1640 = vmatprep.subr.bf16.mxu0 %v1820_v8  ;;  %v1836_v24 = vld [vmem:[%s2409_s1 + $0x48] sm:$0xff]   ;;  %v1840_v28 = vld [vmem:[%s2409_s1 + $0x40] sm:$0xff]   ;;  %v1844_v40 = vld [vmem:[%s2409_s1 + $0x178] sm:$0xff]  }
   0xa   :  { %1662 = vmatprep.subr.bf16.mxu1 %v1821_v9  ;;  %v1837_v25 = vld [vmem:[%s2409_s1 + $0xc8] sm:$0xff]   ;;  %v1841_v29 = vld [vmem:[%s2409_s1 + $0xc0] sm:$0xff]   ;;  %v1845_v41 = vld [vmem:[%s2409_s1 + $0x1f8] sm:$0xff]  }
   0xb   :  { %v1838_v26 = vld [vmem:[%s2409_s1 + $0x8] sm:$0xff]   ;;  %v1842_v30 = vld [vmem:[%s2409_s1] sm:$0xff]   ;;  %v1846_v42 = vld [vmem:[%s2409_s1 + $0x138] sm:$0xff]  }
   0xc   :  { %1641 = vmatpush3.bf16.msra.mxu0 %v1822_v10  ;;  %v1839_v27 = vld [vmem:[%s2409_s1 + $0x88] sm:$0xff]   ;;  %v1843_v31 = vld [vmem:[%s2409_s1 + $0x80] sm:$0xff]   ;;  %v1847_v43 = vld [vmem:[%s2409_s1 + $0x1b8] sm:$0xff]  }
   0xd   :  { %1663 = vmatpush3.bf16.msra.mxu1 %v1823_v11  ;;  %1642 = vmatprep.subr.bf16.mxu0 %v1824_v12  ;;  %v18_v32 = vld [vmem:[%s2410_s0] sm:$0xff]  ;;  %v19_v34 = vld [vmem:[%s2410_s0 + $0x8] sm:$0xff]  ;;  %v1848_v44 = vld [vmem:[%s2409_s1 + $0x170] sm:$0xff]  }
   0xe   :  { %1664 = vmatprep.subr.bf16.mxu1 %v1825_v13  ;;  %v26_v33 = vld [vmem:[%s2410_s0 + $0x40] sm:$0xff]  ;;  %v27_v37 = vld [vmem:[%s2410_s0 + $0x48] sm:$0xff]  ;;  %v1849_v45 = vld [vmem:[%s2409_s1 + $0x1f0] sm:$0xff]  }
   0xf   :  { %v1490_v35 = vcombine.low %v18_v32, %v26_v33  ;;  %v1491_v36 = vcombine.high %v18_v32, %v26_v33  ;;  %v1492_v38 = vcombine.low %v19_v34, %v27_v37  ;;  %v1493_v39 = vcombine.high %v19_v34, %v27_v37  ;;  %v1850_v46 = vld [vmem:[%s2409_s1 + $0x130] sm:$0xff]   ;;  %v1852_v48 = vld [vmem:[%s2409_s1 + $0x168] sm:$0xff]   ;;  %v1856_v52 = vld [vmem:[%s2409_s1 + $0x160] sm:$0xff]  }
  0x10   :  { %1643 = vmatpush3.bf16.msra.mxu0 %v1826_v14  ;;  %v1851_v47 = vld [vmem:[%s2409_s1 + $0x1b0] sm:$0xff]   ;;  %v1853_v49 = vld [vmem:[%s2409_s1 + $0x1e8] sm:$0xff]   ;;  %v1857_v53 = vld [vmem:[%s2409_s1 + $0x1e0] sm:$0xff]  }
  0x11   :  { %1665 = vmatpush3.bf16.msra.mxu1 %v1827_v15  ;;  %1644 = vmatprep.subr.bf16.mxu0 %v1828_v16  ;;  %v1854_v50 = vld [vmem:[%s2409_s1 + $0x128] sm:$0xff]   ;;  %v1858_v54 = vld [vmem:[%s2409_s1 + $0x120] sm:$0xff]   ;;  %v1860_v56 = vld [vmem:[%s2409_s1 + $0x158] sm:$0xff]  }
  0x12   :  { %1666 = vmatprep.subr.bf16.mxu1 %v1829_v17  ;;  %1170 = vmatprep.mubr.bf16.mxu0 %v1491_v36  ;;  %v1855_v51 = vld [vmem:[%s2409_s1 + $0x1a8] sm:$0xff]   ;;  %v1859_v55 = vld [vmem:[%s2409_s1 + $0x1a0] sm:$0xff]   ;;  %v1861_v57 = vld [vmem:[%s2409_s1 + $0x1d8] sm:$0xff]  }
  0x13   :  { %1211 = vmatprep.mubr.bf16.mxu1 %v1493_v39  ;;  %v1862_v58 = vld [vmem:[%s2409_s1 + $0x118] sm:$0xff]   ;;  %v1864_v60 = vld [vmem:[%s2409_s1 + $0x150] sm:$0xff]   ;;  %v1868_v0 = vld [vmem:[%s2409_s1 + $0x148] sm:$0xff]  }
  0x14   :  { %1645 = vmatpush3.bf16.msra.mxu0 %v1830_v18  ;;  %v1863_v59 = vld [vmem:[%s2409_s1 + $0x198] sm:$0xff]   ;;  %v1865_v61 = vld [vmem:[%s2409_s1 + $0x1d0] sm:$0xff]   ;;  %v1869_v1 = vld [vmem:[%s2409_s1 + $0x1c8] sm:$0xff]  }
  0x15   :  { %1667 = vmatpush3.bf16.msra.mxu1 %v1831_v19  ;;  %1646 = vmatprep.subr.bf16.mxu0 %v1832_v20  ;;  %v1866_v62 = vld [vmem:[%s2409_s1 + $0x110] sm:$0xff]   ;;  %v1870_v2 = vld [vmem:[%s2409_s1 + $0x108] sm:$0xff]   ;;  %v1872_v4 = vld [vmem:[%s2409_s1 + $0x140] sm:$0xff]  }
  0x16   :  { %1668 = vmatprep.subr.bf16.mxu1 %v1833_v21  ;;  %v1867_v63 = vld [vmem:[%s2409_s1 + $0x190] sm:$0xff]   ;;  %v1871_v3 = vld [vmem:[%s2409_s1 + $0x188] sm:$0xff]   ;;  %v1873_v5 = vld [vmem:[%s2409_s1 + $0x1c0] sm:$0xff]  }
  0x17   :  { %v1874_v6 = vld [vmem:[%s2409_s1 + $0x100] sm:$0xff]   ;;  %v20_v8 = vld [vmem:[%s2410_s0 + $0x10] sm:$0xff]  ;;  %v21_v12 = vld [vmem:[%s2410_s0 + $0x18] sm:$0xff] }
  0x18   :  { %1647 = vmatpush3.bf16.msra.mxu0 %v1834_v22  ;;  %v1875_v7 = vld [vmem:[%s2409_s1 + $0x180] sm:$0xff]   ;;  %v28_v9 = vld [vmem:[%s2410_s0 + $0x50] sm:$0xff]  ;;  %v29_v13 = vld [vmem:[%s2410_s0 + $0x58] sm:$0xff] }
  0x19   :  { %1669 = vmatpush3.bf16.msra.mxu1 %v1835_v23  ;;  %1648 = vmatprep.subr.bf16.mxu0 %v1836_v24  ;;  %v1494_v10 = vcombine.low %v20_v8, %v28_v9  ;;  %v1495_v11 = vcombine.high %v20_v8, %v28_v9  ;;  %v1496_v14 = vcombine.low %v21_v12, %v29_v13  ;;  %v1876_v16 = vld [vmem:[%s2409_s1 + $0x278] sm:$0xff]   ;;  %v1880_v20 = vld [vmem:[%s2409_s1 + $0x270] sm:$0xff]   ;;  %v1884_v24 = vld [vmem:[%s2409_s1 + $0x268] sm:$0xff]  }
  0x1a   :  { %1670 = vmatprep.subr.bf16.mxu1 %v1837_v25  ;;  %v1497_v15 = vcombine.high %v21_v12, %v29_v13  ;;  %v1877_v17 = vld [vmem:[%s2409_s1 + $0x2f8] sm:$0xff]   ;;  %v1881_v21 = vld [vmem:[%s2409_s1 + $0x2f0] sm:$0xff]   ;;  %v1885_v25 = vld [vmem:[%s2409_s1 + $0x2e8] sm:$0xff]  }
  0x1b   :  { %v1878_v18 = vld [vmem:[%s2409_s1 + $0x238] sm:$0xff]   ;;  %v1882_v22 = vld [vmem:[%s2409_s1 + $0x230] sm:$0xff]  }
  0x1c   :  { %1649 = vmatpush3.bf16.msra.mxu0 %v1838_v26  ;;  %v1879_v19 = vld [vmem:[%s2409_s1 + $0x2b8] sm:$0xff]   ;;  %v1883_v23 = vld [vmem:[%s2409_s1 + $0x2b0] sm:$0xff]   ;;  %v1886_v26 = vld [vmem:[%s2409_s1 + $0x228] sm:$0xff]  }
  0x1d   :  { %1671 = vmatpush3.bf16.msra.mxu1 %v1839_v27  ;;  %1650 = vmatprep.subr.bf16.mxu0 %v1840_v28  ;;  %v1887_v27 = vld [vmem:[%s2409_s1 + $0x2a8] sm:$0xff]   ;;  %v1888_v28 = vld [vmem:[%s2409_s1 + $0x260] sm:$0xff]   ;;  %v1892_v32 = vld [vmem:[%s2409_s1 + $0x258] sm:$0xff]  }
  0x1e   :  { %1672 = vmatprep.subr.bf16.mxu1 %v1841_v29  ;;  %v1889_v29 = vld [vmem:[%s2409_s1 + $0x2e0] sm:$0xff]   ;;  %v1893_v33 = vld [vmem:[%s2409_s1 + $0x2d8] sm:$0xff]   ;;  %v1896_v36 = vld [vmem:[%s2409_s1 + $0x250] sm:$0xff]  }
  0x1f   :  { %v1894_v34 = vld [vmem:[%s2409_s1 + $0x218] sm:$0xff]   ;;  %v1897_v37 = vld [vmem:[%s2409_s1 + $0x2d0] sm:$0xff]  }
  0x20   :  { %1651 = vmatpush3.bf16.msra.mxu0 %v1842_v30  ;;  %v1890_v30 = vld [vmem:[%s2409_s1 + $0x220] sm:$0xff]   ;;  %v1899_v39 = vld [vmem:[%s2409_s1 + $0x290] sm:$0xff]   ;;  %v1924_v8 = vld [vmem:[%s2409_s1 + $0x358] sm:$0xff]  }
  0x21   :  { %1673 = vmatpush3.bf16.msra.mxu1 %v1843_v31  ;;  %1680 = vmatprep.subr.bf16.mxu0 %v1844_v40  ;;  %v1891_v31 = vld [vmem:[%s2409_s1 + $0x2a0] sm:$0xff]   ;;  %v1900_v40 = vld [vmem:[%s2409_s1 + $0x248] sm:$0xff]   ;;  %v1925_v9 = vld [vmem:[%s2409_s1 + $0x3d8] sm:$0xff]  }
  0x22   :  { %1702 = vmatprep.subr.bf16.mxu1 %v1845_v41  ;;  %v1901_v41 = vld [vmem:[%s2409_s1 + $0x2c8] sm:$0xff]   ;;  %v1928_v12 = vld [vmem:[%s2409_s1 + $0x350] sm:$0xff]  }
  0x23   :  { %1171 = vmatmul.mubr.bf16.vlgmr.msra.gmra.mxu0 %v1490_v35  ;;  %v1895_v35 = vld [vmem:[%s2409_s1 + $0x298] sm:$0xff]   ;;  %v1929_v13 = vld [vmem:[%s2409_s1 + $0x3d0] sm:$0xff]  }
  0x24   :  { %1212 = vmatmul.mubr.bf16.vlgmr.msra.gmra.mxu1 %v1492_v38  ;;  %1681 = vmatpush3.bf16.msra.mxu0 %v1846_v42  ;;  %v1898_v38 = vld [vmem:[%s2409_s1 + $0x210] sm:$0xff]   ;;  %v1902_v42 = vld [vmem:[%s2409_s1 + $0x208] sm:$0xff]  }
  0x25   :  { %1703 = vmatpush3.bf16.msra.mxu1 %v1847_v43  ;;  %1682 = vmatprep.subr.bf16.mxu0 %v1848_v44  ;;  %v1903_v43 = vld [vmem:[%s2409_s1 + $0x288] sm:$0xff]   ;;  %v1904_v44 = vld [vmem:[%s2409_s1 + $0x240] sm:$0xff]  }
  0x26   :  { %1704 = vmatprep.subr.bf16.mxu1 %v1849_v45  ;;  %1252 = vmatprep.mubr.bf16.mxu0 %v1495_v11  ;;  %v1905_v45 = vld [vmem:[%s2409_s1 + $0x2c0] sm:$0xff]   ;;  %v1927_v11 = vld [vmem:[%s2409_s1 + $0x398] sm:$0xff]  }
  0x27   :  { %1293 = vmatprep.mubr.bf16.mxu1 %v1497_v15  ;;  %v1931_v15 = vld [vmem:[%s2409_s1 + $0x390] sm:$0xff]  }
  0x28   :  { %1683 = vmatpush3.bf16.msra.mxu0 %v1850_v46  ;;  %v1906_v46 = vld [vmem:[%s2409_s1 + $0x200] sm:$0xff]  }
  0x29   :  { %1705 = vmatpush3.bf16.msra.mxu1 %v1851_v47  ;;  %1684 = vmatprep.subr.bf16.mxu0 %v1852_v48  ;;  %v1907_v47 = vld [vmem:[%s2409_s1 + $0x280] sm:$0xff]  }
  0x2a   :  { %1706 = vmatprep.subr.bf16.mxu1 %v1853_v49  ;;  %v22_v48 = vld [vmem:[%s2410_s0 + $0x20] sm:$0xff] }
  0x2b   :  { %v30_v49 = vld [vmem:[%s2410_s0 + $0x60] sm:$0xff] }
  0x2c   :  { %1685 = vmatpush3.bf16.msra.mxu0 %v1854_v50  ;;  %v23_v50 = vld [vmem:[%s2410_s0 + $0x28] sm:$0xff] }
  0x2d   :  { %1707 = vmatpush3.bf16.msra.mxu1 %v1855_v51  ;;  %1686 = vmatprep.subr.bf16.mxu0 %v1856_v52  ;;  %v31_v51 = vld [vmem:[%s2410_s0 + $0x68] sm:$0xff]  ;;  %v1498_v52 = vcombine.low %v22_v48, %v30_v49 }
  0x2e   :  { %1708 = vmatprep.subr.bf16.mxu1 %v1857_v53  ;;  %v1499_v53 = vcombine.high %v22_v48, %v30_v49 }
  0x30   :  { %1687 = vmatpush3.bf16.msra.mxu0 %v1858_v54  ;;  %v1500_v54 = vcombine.low %v23_v50, %v31_v51 }
  0x31   :  { %1709 = vmatpush3.bf16.msra.mxu1 %v1859_v55  ;;  %1688 = vmatprep.subr.bf16.mxu0 %v1860_v56  ;;  %v1501_v55 = vcombine.high %v23_v50, %v31_v51  ;;  %v1908_v56 = vld [vmem:[%s2409_s1 + $0x378] sm:$0xff]  }
  0x32   :  { %1710 = vmatprep.subr.bf16.mxu1 %v1861_v57  ;;  %v1909_v57 = vld [vmem:[%s2409_s1 + $0x3f8] sm:$0xff]  }
  0x34   :  { %1689 = vmatpush3.bf16.msra.mxu0 %v1862_v58  ;;  %v1910_v58 = vld [vmem:[%s2409_s1 + $0x338] sm:$0xff]  }
  0x35   :  { %1711 = vmatpush3.bf16.msra.mxu1 %v1863_v59  ;;  %1690 = vmatprep.subr.bf16.mxu0 %v1864_v60  ;;  %v1911_v59 = vld [vmem:[%s2409_s1 + $0x3b8] sm:$0xff]   ;;  %v1912_v60 = vld [vmem:[%s2409_s1 + $0x370] sm:$0xff]  }
  0x36   :  { %1712 = vmatprep.subr.bf16.mxu1 %v1865_v61  ;;  %v1913_v61 = vld [vmem:[%s2409_s1 + $0x3f0] sm:$0xff]  }
  0x38   :  { %1691 = vmatpush3.bf16.msra.mxu0 %v1866_v62  ;;  %v1914_v62 = vld [vmem:[%s2409_s1 + $0x330] sm:$0xff]  }
  0x39   :  { %1713 = vmatpush3.bf16.msra.mxu1 %v1867_v63  ;;  %1692 = vmatprep.subr.bf16.mxu0 %v1868_v0  ;;  %v1915_v63 = vld [vmem:[%s2409_s1 + $0x3b0] sm:$0xff]   ;;  %v1916_v0 = vld [vmem:[%s2409_s1 + $0x368] sm:$0xff]  }
  0x3a   :  { %1714 = vmatprep.subr.bf16.mxu1 %v1869_v1  ;;  %v1917_v1 = vld [vmem:[%s2409_s1 + $0x3e8] sm:$0xff]  }
  0x3c   :  { %1693 = vmatpush3.bf16.msra.mxu0 %v1870_v2  ;;  %v1918_v2 = vld [vmem:[%s2409_s1 + $0x328] sm:$0xff]  }
  0x3d   :  { %1715 = vmatpush3.bf16.msra.mxu1 %v1871_v3  ;;  %1694 = vmatprep.subr.bf16.mxu0 %v1872_v4  ;;  %v1919_v3 = vld [vmem:[%s2409_s1 + $0x3a8] sm:$0xff]   ;;  %v1920_v4 = vld [vmem:[%s2409_s1 + $0x360] sm:$0xff]  }
  0x3e   :  { %1716 = vmatprep.subr.bf16.mxu1 %v1873_v5  ;;  %v1921_v5 = vld [vmem:[%s2409_s1 + $0x3e0] sm:$0xff]  }
  0x40   :  { %1695 = vmatpush3.bf16.msra.mxu0 %v1874_v6  ;;  %v1922_v6 = vld [vmem:[%s2409_s1 + $0x320] sm:$0xff]  }
  0x41   :  { %1717 = vmatpush3.bf16.msra.mxu1 %v1875_v7  ;;  %1724 = vmatprep.subr.bf16.mxu0 %v1876_v16  ;;  %v1923_v7 = vld [vmem:[%s2409_s1 + $0x3a0] sm:$0xff]   ;;  %v1932_v16 = vld [vmem:[%s2409_s1 + $0x348] sm:$0xff]  }
  0x42   :  { %1746 = vmatprep.subr.bf16.mxu1 %v1877_v17  ;;  %v1933_v17 = vld [vmem:[%s2409_s1 + $0x3c8] sm:$0xff]  }
  0x43   :  { %1253 = vmatmul.mubr.bf16.vlgmr.msra.gmra.mxu0 %v1494_v10  ;;  %v1926_v10 = vld [vmem:[%s2409_s1 + $0x318] sm:$0xff]  }
  0x44   :  { %1294 = vmatmul.mubr.bf16.vlgmr.msra.gmra.mxu1 %v1496_v14  ;;  %1725 = vmatpush3.bf16.msra.mxu0 %v1878_v18  ;;  %v1930_v14 = vld [vmem:[%s2409_s1 + $0x310] sm:$0xff]   ;;  %v1934_v18 = vld [vmem:[%s2409_s1 + $0x308] sm:$0xff]  }
  0x45   :  { %1747 = vmatpush3.bf16.msra.mxu1 %v1879_v19  ;;  %1726 = vmatprep.subr.bf16.mxu0 %v1880_v20  ;;  %v1935_v19 = vld [vmem:[%s2409_s1 + $0x388] sm:$0xff]   ;;  %v1936_v20 = vld [vmem:[%s2409_s1 + $0x340] sm:$0xff]  }
  0x46   :  { %1748 = vmatprep.subr.bf16.mxu1 %v1881_v21  ;;  %1334 = vmatprep.mubr.bf16.mxu0 %v1499_v53  ;;  %v1937_v21 = vld [vmem:[%s2409_s1 + $0x3c0] sm:$0xff]  }
  0x47   :  { %1375 = vmatprep.mubr.bf16.mxu1 %v1501_v55 }
  0x48   :  { %1727 = vmatpush3.bf16.msra.mxu0 %v1882_v22  ;;  %v1938_v22 = vld [vmem:[%s2409_s1 + $0x300] sm:$0xff]  }
  0x49   :  { %1749 = vmatpush3.bf16.msra.mxu1 %v1883_v23  ;;  %1728 = vmatprep.subr.bf16.mxu0 %v1884_v24  ;;  %v1939_v23 = vld [vmem:[%s2409_s1 + $0x380] sm:$0xff]   ;;  %v24_v24 = vld [vmem:[%s2410_s0 + $0x30] sm:$0xff] }
  0x4a   :  { %1750 = vmatprep.subr.bf16.mxu1 %v1885_v25  ;;  %v32_v25 = vld [vmem:[%s2410_s0 + $0x70] sm:$0xff] }
  0x4c   :  { %1729 = vmatpush3.bf16.msra.mxu0 %v1886_v26  ;;  %v25_v26 = vld [vmem:[%s2410_s0 + $0x38] sm:$0xff] }
  0x4d   :  { %1751 = vmatpush3.bf16.msra.mxu1 %v1887_v27  ;;  %1730 = vmatprep.subr.bf16.mxu0 %v1888_v28  ;;  %v1502_v27 = vcombine.low %v24_v24, %v32_v25  ;;  %v1503_v28 = vcombine.high %v24_v24, %v32_v25 }
  0x4e   :  { %1752 = vmatprep.subr.bf16.mxu1 %v1889_v29  ;;  %v33_v29 = vld [vmem:[%s2410_s0 + $0x78] sm:$0xff] }
  0x50   :  { %1731 = vmatpush3.bf16.msra.mxu0 %v1890_v30  ;;  %v1504_v30 = vcombine.low %v25_v26, %v33_v29 }
  0x51   :  { %1753 = vmatpush3.bf16.msra.mxu1 %v1891_v31  ;;  %1732 = vmatprep.subr.bf16.mxu0 %v1892_v32  ;;  %v1505_v31 = vcombine.high %v25_v26, %v33_v29 }
  0x52   :  { %1754 = vmatprep.subr.bf16.mxu1 %v1893_v33 }
  0x54   :  { %1733 = vmatpush3.bf16.msra.mxu0 %v1894_v34 }
  0x55   :  { %1755 = vmatpush3.bf16.msra.mxu1 %v1895_v35  ;;  %1734 = vmatprep.subr.bf16.mxu0 %v1896_v36 }
  0x56   :  { %1756 = vmatprep.subr.bf16.mxu1 %v1897_v37 }
  0x58   :  { %1735 = vmatpush3.bf16.msra.mxu0 %v1898_v38 }
  0x59   :  { %1757 = vmatpush3.bf16.msra.mxu1 %v1899_v39  ;;  %1736 = vmatprep.subr.bf16.mxu0 %v1900_v40 }
  0x5a   :  { %1758 = vmatprep.subr.bf16.mxu1 %v1901_v41 }
  0x5c   :  { %1737 = vmatpush3.bf16.msra.mxu0 %v1902_v42 }
  0x5d   :  { %1759 = vmatpush3.bf16.msra.mxu1 %v1903_v43  ;;  %1738 = vmatprep.subr.bf16.mxu0 %v1904_v44 }
  0x5e   :  { %1760 = vmatprep.subr.bf16.mxu1 %v1905_v45 }
  0x60   :  { %1739 = vmatpush3.bf16.msra.mxu0 %v1906_v46 }
  0x61   :  { %1761 = vmatpush3.bf16.msra.mxu1 %v1907_v47  ;;  %1768 = vmatprep.subr.bf16.mxu0 %v1908_v56 }
  0x62   :  { %1790 = vmatprep.subr.bf16.mxu1 %v1909_v57 }
  0x63   :  { %1335 = vmatmul.mubr.bf16.vlgmr.msra.gmra.mxu0 %v1498_v52 }
  0x64   :  { %1376 = vmatmul.mubr.bf16.vlgmr.msra.gmra.mxu1 %v1500_v54  ;;  %1769 = vmatpush3.bf16.msra.mxu0 %v1910_v58 }
  0x65   :  { %1791 = vmatpush3.bf16.msra.mxu1 %v1911_v59  ;;  %1770 = vmatprep.subr.bf16.mxu0 %v1912_v60 }
  0x66   :  { %1792 = vmatprep.subr.bf16.mxu1 %v1913_v61  ;;  %1416 = vmatprep.mubr.bf16.mxu0 %v1503_v28  ;;  %v1635_v28 = vld [vmem:[%s2412_s3] ss:$0 sm:$0xff] }
  0x67   :  { %1457 = vmatprep.mubr.bf16.mxu1 %v1505_v31 }
  0x68   :  { %1771 = vmatpush3.bf16.msra.mxu0 %v1914_v62 }
  0x69   :  { %1793 = vmatpush3.bf16.msra.mxu1 %v1915_v63  ;;  %1772 = vmatprep.subr.bf16.mxu0 %v1916_v0 }
  0x6a   :  { %1794 = vmatprep.subr.bf16.mxu1 %v1917_v1 }
  0x6c   :  { %1773 = vmatpush3.bf16.msra.mxu0 %v1918_v2 }
  0x6d   :  { %1795 = vmatpush3.bf16.msra.mxu1 %v1919_v3  ;;  %1774 = vmatprep.subr.bf16.mxu0 %v1920_v4 }
  0x6e   :  { %1796 = vmatprep.subr.bf16.mxu1 %v1921_v5 }
  0x70   :  { %1775 = vmatpush3.bf16.msra.mxu0 %v1922_v6 }
  0x71   :  { %1797 = vmatpush3.bf16.msra.mxu1 %v1923_v7  ;;  %1776 = vmatprep.subr.bf16.mxu0 %v1924_v8 }
  0x72   :  { %1798 = vmatprep.subr.bf16.mxu1 %v1925_v9 }
  0x74   :  { %1777 = vmatpush3.bf16.msra.mxu0 %v1926_v10 }
  0x75   :  { %1799 = vmatpush3.bf16.msra.mxu1 %v1927_v11  ;;  %1778 = vmatprep.subr.bf16.mxu0 %v1928_v12 }
  0x76   :  { %1800 = vmatprep.subr.bf16.mxu1 %v1929_v13 }
  0x78   :  { %1779 = vmatpush3.bf16.msra.mxu0 %v1930_v14 }
  0x79   :  { %1801 = vmatpush3.bf16.msra.mxu1 %v1931_v15  ;;  %1780 = vmatprep.subr.bf16.mxu0 %v1932_v16 }
  0x7a   :  { %1802 = vmatprep.subr.bf16.mxu1 %v1933_v17 }
  0x7c   :  { %1781 = vmatpush3.bf16.msra.mxu0 %v1934_v18 }
  0x7d   :  { %1803 = vmatpush3.bf16.msra.mxu1 %v1935_v19  ;;  %1782 = vmatprep.subr.bf16.mxu0 %v1936_v20 }
  0x7e   :  { %1804 = vmatprep.subr.bf16.mxu1 %v1937_v21 }
  0x80   :  { %1783 = vmatpush3.bf16.msra.mxu0 %v1938_v22  ;;  %v1634_v22 = vld [vmem:[%s2411_s2] ss:$0 sm:$0xff] }
  0x81   :  { %1805 = vmatpush3.bf16.msra.mxu1 %v1939_v23 }
  0x83   :  { %1417 = vmatmul.mubr.bf16.vlgmr.msra.gmra.mxu0 %v1502_v27 }
  0x84   :  { %1458 = vmatmul.mubr.bf16.vlgmr.msra.gmra.mxu1 %v1504_v30 }
  0xe3   :  { %v1652_v32 = vpop.f32.mrf.mxu0 }
  0xe4   :  { %v1674_v33 = vpop.f32.mrf.mxu1 }
  0xe5   :  { %v1653_v34 = vpop.f32.mrf.mxu0 }
  0xe6   :  { %v1675_v35 = vpop.f32.mrf.mxu1  ;;  %v1654_v49 = vadd.f32 %v1653_v34, %v1652_v32 }
  0xe7   :  { %v1655_v36 = vpop.f32.mrf.mxu0  ;;  %v1676_v50 = vadd.f32 %v1675_v35, %v1674_v33 }
  0xe8   :  { %v1677_v37 = vpop.f32.mrf.mxu1 }
  0xe9   :  { %v1656_v38 = vpop.f32.mrf.mxu0  ;;  %v1214_v54 = vadd.f32 %v1676_v50, %v1654_v49 }
  0xea   :  { %v1678_v40 = vpop.f32.mrf.mxu1  ;;  %v1657_v55 = vadd.f32 %v1656_v38, %v1655_v36 }
  0xeb   :  { %v1679_v56 = vadd.f32 %v1678_v40, %v1677_v37 }
  0xed   :  { %v1217_v62 = vadd.f32 %v1679_v56, %v1657_v55 }
 0x103   :  { %v1696_v39 = vpop.f32.mrf.mxu0 }
 0x104   :  { %v1718_v41 = vpop.f32.mrf.mxu1 }
 0x105   :  { %v1697_v42 = vpop.f32.mrf.mxu0 }
 0x106   :  { %v1719_v43 = vpop.f32.mrf.mxu1  ;;  %v1698_v53 = vadd.f32 %v1697_v42, %v1696_v39 }
 0x107   :  { %v1699_v44 = vpop.f32.mrf.mxu0  ;;  %v1720_v60 = vadd.f32 %v1719_v43, %v1718_v41 }
 0x108   :  { %v1721_v45 = vpop.f32.mrf.mxu1  ;;  %v1255_v59 = vadd.f32 %v1698_v53, %v1214_v54 }
 0x109   :  { %v1700_v46 = vpop.f32.mrf.mxu0 }
 0x10a   :  { %v1722_v48 = vpop.f32.mrf.mxu1  ;;  %v1701_v61 = vadd.f32 %v1700_v46, %v1699_v44  ;;  %v1296_v2 = vadd.f32 %v1720_v60, %v1255_v59 }
 0x10b   :  { %v1723_v4 = vadd.f32 %v1722_v48, %v1721_v45 }
 0x10c   :  { %v1258_v3 = vadd.f32 %v1701_v61, %v1217_v62 }
 0x10e   :  { %v1299_v10 = vadd.f32 %v1723_v4, %v1258_v3 }
 0x123   :  { %v1740_v47 = vpop.f32.mrf.mxu0 }
 0x124   :  { %v1762_v51 = vpop.f32.mrf.mxu1 }
 0x125   :  { %v1741_v52 = vpop.f32.mrf.mxu0 }
 0x126   :  { %v1763_v57 = vpop.f32.mrf.mxu1  ;;  %v1742_v63 = vadd.f32 %v1741_v52, %v1740_v47 }
 0x127   :  { %v1743_v58 = vpop.f32.mrf.mxu0  ;;  %v1764_v6 = vadd.f32 %v1763_v57, %v1762_v51 }
 0x128   :  { %v1765_v0 = vpop.f32.mrf.mxu1  ;;  %v1337_v5 = vadd.f32 %v1742_v63, %v1296_v2 }
 0x129   :  { %v1744_v1 = vpop.f32.mrf.mxu0 }
 0x12a   :  { %v1745_v7 = vadd.f32 %v1744_v1, %v1743_v58  ;;  %v1766_v8 = vpop.f32.mrf.mxu1  ;;  %v1378_v13 = vadd.f32 %v1764_v6, %v1337_v5 }
 0x12b   :  { %v1767_v18 = vadd.f32 %v1766_v8, %v1765_v0 }
 0x12c   :  { %v1340_v14 = vadd.f32 %v1745_v7, %v1299_v10 }
 0x12e   :  { %v1381_v24 = vadd.f32 %v1767_v18, %v1340_v14 }
 0x143   :  { %v1784_v9 = vpop.f32.mrf.mxu0 }
 0x144   :  { %v1806_v11 = vpop.f32.mrf.mxu1 }
 0x145   :  { %v1785_v12 = vpop.f32.mrf.mxu0 }
 0x146   :  { %v1786_v15 = vadd.f32 %v1785_v12, %v1784_v9  ;;  %v1807_v16 = vpop.f32.mrf.mxu1 }
 0x147   :  { %v1787_v17 = vpop.f32.mrf.mxu0  ;;  %v1808_v20 = vadd.f32 %v1807_v16, %v1806_v11 }
 0x148   :  { %v1419_v19 = vadd.f32 %v1786_v15, %v1378_v13  ;;  %v1809_v21 = vpop.f32.mrf.mxu1 }
 0x149   :  { %v1788_v23 = vpop.f32.mrf.mxu0 }
 0x14a   :  { %v1460_v25 = vadd.f32 %v1808_v20, %v1419_v19  ;;  %v1789_v26 = vadd.f32 %v1788_v23, %v1787_v17  ;;  %v1810_v27 = vpop.f32.mrf.mxu1 }
 0x14b   :  { %v1811_v31 = vadd.f32 %v1810_v27, %v1809_v21 }
 0x14c   :  { %v1473_v29 = vmul.f32 %v1634_v22, %v1460_v25  ;;  %v1422_v30 = vadd.f32 %v1789_v26, %v1381_v24 }
 0x14e   :  { %v1482_v32 = vadd.f32 %v1635_v28, %v1473_v29  ;;  %v1463_v33 = vadd.f32 %v1811_v31, %v1422_v30 }
 0x150   :  { %1484 = vst [vmem:[%s2413_s4] sm:$0xff] %v1482_v32  ;;  %v1474_v34 = vmul.f32 %v1634_v22, %v1463_v33 }
 0x152   :  { %v1483_v35 = vadd.f32 %v1635_v28, %v1474_v34 }
 0x154   :  { %1485 = vst [vmem:[%s2413_s4 + $0x8] sm:$0xff] %v1483_v35 }

</bundles_post_ra>
